<compile_context>
chip_gen: v7x
topology: tpu7x:2x2x1
jax: 0.10.0
libtpu: 0.0.40
codegen_flags: <defaults>
</compile_context>

<pallas_src>
import functools

import jax
import jax.numpy as jnp
from jax import lax
from jax.experimental import pallas as pl
from jax.experimental.pallas import tpu as pltpu


_TAPS = tuple((dy, dx) for dy in (-1, 0, 1) for dx in (-1, 0, 1))  # 3x3, row-major


# ----------------------------------------------------------------------------
# Pallas kernel
# ----------------------------------------------------------------------------
def _cnn_weight_kernel(x_ref, w1_ref, b1_ref, w2_ref, mask_ref, b2_ref, o_ref, *,
                       W, act, max_weight):
    Bt, Cin_pad, S = x_ref.shape            # spatial-in-lanes: S = H*W on lanes
    Ch = w1_ref.shape[0]

    x = x_ref[...]                          # (Bt, Cin_pad, S) f32
    masks = mask_ref[...]                   # (9, S) 0/1 f32 border masks

    def shifted(v, t):
        """Tap t of a 3x3/pad-1 conv: lane roll + border mask (zero halo)."""
        dy, dx = _TAPS[t]
        if dy == 0 and dx == 0:
            return v                        # center tap: no roll, mask is all-ones
        d = dy * W + dx
        r = pltpu.roll(v, shift=(-d) % S, axis=2)           # XLU lane rotate
        return r * masks[t:t + 1, :][None, :, :]            # zero out wrapped border

    # ---- conv1: sublane-aligned im2col (Cin_pad multiple of 8) + MXU matmul ----
    col = jnp.concatenate([shifted(x, t) for t in range(9)], axis=1)  # (Bt, 9*Cin_pad, S)
    w1 = w1_ref[...]                                                  # (Ch, 9*Cin_pad)
    col = col.astype(w1.dtype)                                        # bf16 MXU opt-in
    h = jnp.stack(
        [jnp.dot(w1, col[b], preferred_element_type=jnp.float32) for b in range(Bt)],
        axis=0)                                                       # (Bt, Ch, S)
    h = jnp.maximum(h + b1_ref[...][None, :, :], 0.0)                 # bias + ReLU

    # ---- conv2 (1 out channel): 9 VPU FMAs on lane-rolled h + sublane reduce ----
    w2 = w2_ref[...]                                                  # (Ch, 9)
    acc = jnp.zeros(h.shape, jnp.float32)
    for t in range(9):
        acc = acc + shifted(h, t) * w2[:, t:t + 1][None, :, :]
    y = jnp.sum(acc, axis=1, keepdims=True) + b2_ref[0, 0]            # (Bt, 1, S)

    # ---- compute_final_activation ----
    if act == 'elu':
        y = jnp.where(y > 0, y, jnp.exp(y) - 1.0) + 1.0
    elif act == 'one':
        y = y + 1.0
    elif act == 'relu':
        y = jnp.maximum(y, 0.0)
    elif act == 'relu_one':
        y = jnp.maximum(y, 0.0) + 1.0
    elif act == 'exp':
        y = jnp.exp(y)
    elif act == 'abs':
        y = jnp.abs(y)
    elif act == 'none':
        pass
    else:
        raise AttributeError(f'No {act} that works.')
    if max_weight is not None:
        y = jnp.minimum(y, jnp.float32(max_weight))

    o_ref[...] = y.astype(o_ref.dtype)      # lane-dense (b_tile, 1, H*W) store


# ----------------------------------------------------------------------------
# Padding-aware VMEM accounting + generation-aware budgets
# ----------------------------------------------------------------------------
def _pad_elems(shape):
    """Element count of an f32 value after TPU (8, 128) sublane/lane padding."""
    shape = tuple(int(d) for d in shape)
    if len(shape) == 1:
        shape = (1,) + shape
    lead = 1
    for d in shape[:-2]:
        lead *= d
    sub = -(-shape[-2] // 8) * 8
    lane = -(-shape[-1] // 128) * 128
    return lead * sub * lane


def _kernel_vmem_bytes(bt, S, Cin_pad, Ch):
    """(8,128)-padding-aware per-grid-step VMEM footprint in bytes (f32)."""
    K9 = 9 * Cin_pad
    e = 0
    e += 2 * _pad_elems((bt, Cin_pad, S))                    # x block, double buffered
    e += 2 * _pad_elems((bt, 1, S))                          # out block, double buffered
    e += 2 * (_pad_elems((Ch, K9)) + _pad_elems((Ch, 1))
              + _pad_elems((Ch, 9)) + _pad_elems((9, S)))    # params + masks
    e += 3 * _pad_elems((bt, Cin_pad, S))                    # x value + roll/mask temps
    e += _pad_elems((bt, K9, S))                             # im2col stack
    e += 3 * _pad_elems((bt, Ch, S))                         # h, conv2 acc, roll temp
    e += 3 * _pad_elems((bt, 1, S))                          # y + activation temps
    return 4 * e


def _vmem_budget():
    """Generation-aware (tile budget, vmem_limit cap) in bytes."""
    try:
        cap = int(pltpu.get_tpu_info().vmem_capacity_bytes)
    except Exception:
        cap = 64 << 20                       # conservative fallback (v7x-class)
    if cap <= (64 << 20):                    # v7x: 64 MiB per TensorCore
        return 12 << 20, 40 << 20
    return 32 << 20, 64 << 20                # v5e / v6e: 128 MiB physical VMEM


def _pick_b_tile(B, S, Cin_pad, Ch, budget_bytes, max_tile=32):
    """Largest batch tile that fits the padded budget; prefer >=2 grid steps
    (keeps both v7x TensorCores busy); b_tile=1 always exists as a fallback."""
    divs = [d for d in range(1, min(B, max_tile) + 1) if B % d == 0]
    fit = [d for d in divs if _kernel_vmem_bytes(d, S, Cin_pad, Ch) <= budget_bytes]
    if not fit:
        return 1
    multi = [d for d in fit if B // d >= 2]
    return max(multi) if multi else max(fit)


# ----------------------------------------------------------------------------
# Wrapper (JAX/Pallas equivalent of CNNWeightModule.forward, depth=1)
# ----------------------------------------------------------------------------
def cnn_weight_forward(s_point, s_normal, t_point, t_normal, params,
                       mode='point', final_activation='none', max_weight=None,
                       b_tile=None, use_bf16_mxu=False):
    # prepare_input (the PyTorch NCHW permute is layout plumbing; math is identical)
    if mode == 'point_normal':
        x = jnp.concatenate([s_point, s_normal, t_point, t_normal], axis=-1)
    elif mode == 'point':
        x = jnp.concatenate([s_point, t_point], axis=-1)
    elif mode == 'normal':
        x = jnp.concatenate([s_normal, t_normal], axis=-1)
    else:
        raise AttributeError(f'No {mode} that works.')
    x = x.astype(jnp.float32)
    B, H, W, Cin = x.shape
    S = H * W

    w1, b1, w2, b2 = params
    Ch = w1.shape[-1]
    assert w1.shape == (3, 3, Cin, Ch) and w2.shape == (3, 3, Ch, 1)
    assert b1.shape == (Ch,) and b2.shape == (1,)

    # spatial-in-lanes layout: (B, Cin_pad, H*W); channels zero-padded to sublane mult.
    Cin_pad = -(-Cin // 8) * 8
    x = jnp.transpose(x, (0, 3, 1, 2)).reshape(B, Cin, S)
    if Cin_pad > Cin:
        x = jnp.pad(x, ((0, 0), (0, Cin_pad - Cin), (0, 0)))

    # parameter layouts (done once, outside the kernel)
    w1p = jnp.pad(w1, ((0, 0), (0, 0), (0, Cin_pad - Cin), (0, 0))).astype(jnp.float32)
    w1_ck = jnp.transpose(w1p, (3, 0, 1, 2)).reshape(Ch, 9 * Cin_pad)   # (Ch, 9*Cin_pad)
    if use_bf16_mxu:
        w1_ck = w1_ck.astype(jnp.bfloat16)   # bf16 MXU operands, f32 accumulation
    b1r = b1.reshape(Ch, 1).astype(jnp.float32)
    w2r = jnp.transpose(w2[..., 0], (2, 0, 1)).reshape(Ch, 9).astype(jnp.float32)
    b2s = b2.reshape(1, 1).astype(jnp.float32)                          # scalar -> SMEM

    # 0/1 border masks for the 9 taps of a 3x3 / pad-1 conv over flattened s = h*W+w
    h_idx = jnp.repeat(jnp.arange(H), W)
    w_idx = jnp.tile(jnp.arange(W), H)
    mask9 = jnp.stack(
        [((h_idx + dy >= 0) & (h_idx + dy < H) &
          (w_idx + dx >= 0) & (w_idx + dx < W)).astype(jnp.float32)
         for dy, dx in _TAPS], axis=0)                                  # (9, S)

    budget, limit_cap = _vmem_budget()
    if b_tile is None:
        b_tile = _pick_b_tile(B, S, Cin_pad, Ch, budget)
    assert B % b_tile == 0
    grid = (B // b_tile,)

    est = _kernel_vmem_bytes(b_tile, S, Cin_pad, Ch)
    vmem_limit = int(min(limit_cap, max(32 << 20, 2 * est)))

    flops = 2 * B * S * 9 * Ch * (Cin_pad + 1)
    transc = B * S if final_activation in ('elu', 'exp') else 0
    bytes_acc = 4 * (B * Cin_pad * S + B * S + Ch * (9 * Cin_pad + 10) + 9 * S)

    kernel = functools.partial(_cnn_weight_kernel, W=W,
                               act=final_activation, max_weight=max_weight)

    out = pl.pallas_call(
        kernel,
        out_shape=jax.ShapeDtypeStruct((B, 1, S), jnp.float32),
        grid=grid,
        in_specs=[
            pl.BlockSpec((b_tile, Cin_pad, S), lambda b: (b, 0, 0)),
            pl.BlockSpec((Ch, 9 * Cin_pad), lambda b: (0, 0)),
            pl.BlockSpec((Ch, 1), lambda b: (0, 0)),
            pl.BlockSpec((Ch, 9), lambda b: (0, 0)),
            pl.BlockSpec((9, S), lambda b: (0, 0)),
            pl.BlockSpec(memory_space=pltpu.MemorySpace.SMEM),
        ],
        out_specs=pl.BlockSpec((b_tile, 1, S), lambda b: (b, 0, 0)),
        compiler_params=pltpu.CompilerParams(
            dimension_semantics=("parallel",),
            vmem_limit_bytes=vmem_limit),
        cost_estimate=pl.CostEstimate(flops=flops, transcendentals=transc,
                                      bytes_accessed=bytes_acc),
    )(x, w1_ck, b1r, w2r, mask9, b2s)

    # match PyTorch NCHW output convention: (B, 1, H, W)
    weights = out.reshape(B, 1, H, W)
    return dict(weights=weights, latent=None)


# ----------------------------------------------------------------------------
# pure-JAX reference (for verification only)
# ----------------------------------------------------------------------------
def _ref_final_activation(y, act, max_weight):
    if act == 'elu':
        y = jnp.where(y > 0, y, jnp.exp(y) - 1.0) + 1.0
    elif act == 'one':
        y = y + 1.0
    elif act == 'relu':
        y = jnp.maximum(y, 0.0)
    elif act == 'relu_one':
        y = jnp.maximum(y, 0.0) + 1.0
    elif act == 'exp':
        y = jnp.exp(y)
    elif act == 'abs':
        y = jnp.abs(y)
    if max_weight is not None:
        y = jnp.minimum(y, max_weight)
    return y


def _ref_forward(s_point, s_normal, t_point, t_normal, params,
                 mode='point', final_activation='none', max_weight=None):
    if mode == 'point_normal':
        x = jnp.concatenate([s_point, s_normal, t_point, t_normal], axis=-1)
    elif mode == 'point':
        x = jnp.concatenate([s_point, t_point], axis=-1)
    else:
        x = jnp.concatenate([s_normal, t_normal], axis=-1)
    x = x.astype(jnp.float32)
    w1, b1, w2, b2 = params
    dn = ('NHWC', 'HWIO', 'NHWC')
    h = lax.conv_general_dilated(x, w1, (1, 1), 'SAME', dimension_numbers=dn,
                                 precision=lax.Precision.HIGHEST) + b1
    h = jnp.maximum(h, 0.0)
    y = lax.conv_general_dilated(h, w2, (1, 1), 'SAME', dimension_numbers=dn,
                                 precision=lax.Precision.HIGHEST) + b2
    y = _ref_final_activation(y, final_activation, max_weight)
    return jnp.transpose(y, (0, 3, 1, 2))


if __name__ == "__main__":
    # small shapes: batch=2, spatial=16x16, 3-vec points/normals, hidden features=32
    B, H, W = 2, 16, 16
    features = 32

    key = jax.random.PRNGKey(0)
    ks = jax.random.split(key, 12)
    s_point = jax.random.normal(ks[0], (B, H, W, 3), jnp.float32)
    s_normal = jax.random.normal(ks[1], (B, H, W, 3), jnp.float32)
    t_point = jax.random.normal(ks[2], (B, H, W, 3), jnp.float32)
    t_normal = jax.random.normal(ks[3], (B, H, W, 3), jnp.float32)

    def make_params(cin, kbase):
        w1 = 0.1 * jax.random.normal(ks[kbase + 0], (3, 3, cin, features), jnp.float32)
        b1 = 0.1 * jax.random.normal(ks[kbase + 1], (features,), jnp.float32)
        w2 = 0.1 * jax.random.normal(ks[kbase + 2], (3, 3, features, 1), jnp.float32)
        b2 = 0.1 * jax.random.normal(ks[kbase + 3], (1,), jnp.float32)
        return (w1, b1, w2, b2)

    # config 1: module defaults (mode='point' -> 6 input channels, no activation)
    p6 = make_params(6, 4)
    out = cnn_weight_forward(s_point, s_normal, t_point, t_normal, p6,
                             mode='point', final_activation='none', max_weight=None)
    w_out = jax.block_until_ready(out['weights'])
    assert w_out.shape == (B, 1, H, W)
    ref = _ref_forward(s_point, s_normal, t_point, t_normal, p6,
                       mode='point', final_activation='none', max_weight=None)
    assert jnp.allclose(w_out, ref, atol=1e-3, rtol=1e-3), "mismatch vs reference (point/none)"

    # config 2: mode='point_normal' (12 channels), ELU+1 activation, clamp
    p12 = make_params(12, 8)
    out2 = cnn_weight_forward(s_point, s_normal, t_point, t_normal, p12,
                              mode='point_normal', final_activation='elu', max_weight=2.0)
    w_out2 = jax.block_until_ready(out2['weights'])
    ref2 = _ref_forward(s_point, s_normal, t_point, t_normal, p12,
                        mode='point_normal', final_activation='elu', max_weight=2.0)
    assert jnp.allclose(w_out2, ref2, atol=1e-3, rtol=1e-3), "mismatch vs reference (pn/elu)"

    print("KERNEL_OK")
</pallas_src>

<mosaic_0001>
module attributes {stable_mosaic.version = 11 : i64} {
  func.func @_cnn_weight_kernel(%arg0: i32, %arg1: memref<1x8x256xf32, #tpu.memory_space<vmem>>, %arg2: memref<32x72xf32, #tpu.memory_space<vmem>>, %arg3: memref<32x1xf32, #tpu.memory_space<vmem>>, %arg4: memref<32x9xf32, #tpu.memory_space<vmem>>, %arg5: memref<9x256xf32, #tpu.memory_space<vmem>>, %arg6: memref<1x1xf32, #tpu.memory_space<smem>>, %arg7: memref<1x1x256xf32, #tpu.memory_space<vmem>>) attributes {dimension_semantics = [#tpu.dimension_semantics<parallel>], iteration_bounds = array<i64: 2>, scalar_prefetch = 0 : i64, scratch_operands = 0 : i64, tpu.core_type = #tpu.core_type<tc>, window_params = [{transform_indices = @transform_0, window_bounds = array<i64: 1, 8, 256>}, {pipeline_mode = #tpu.pipeline_mode<synchronous>, transform_indices = @transform_1, window_bounds = array<i64: 32, 72>}, {pipeline_mode = #tpu.pipeline_mode<synchronous>, transform_indices = @transform_2, window_bounds = array<i64: 32, 1>}, {pipeline_mode = #tpu.pipeline_mode<synchronous>, transform_indices = @transform_3, window_bounds = array<i64: 32, 9>}, {pipeline_mode = #tpu.pipeline_mode<synchronous>, transform_indices = @transform_4, window_bounds = array<i64: 9, 256>}, {transform_indices = @transform_5, window_bounds = array<i64: 1, 1>}, {transform_indices = @transform_6, window_bounds = array<i64: 1, 1, 256>}]} {
    %c0 = arith.constant 0 : index
    %c0_0 = arith.constant 0 : index
    %c0_1 = arith.constant 0 : index
    %0 = vector.load %arg1[%c0, %c0_0, %c0_1] : memref<1x8x256xf32, #tpu.memory_space<vmem>>, vector<1x8x256xf32>
    %c0_2 = arith.constant 0 : index
    %c0_3 = arith.constant 0 : index
    %1 = vector.load %arg5[%c0_2, %c0_3] : memref<9x256xf32, #tpu.memory_space<vmem>>, vector<9x256xf32>
    %c17_i32 = arith.constant 17 : i32
    %2 = tpu.dynamic_rotate %0 by %c17_i32 dim 2 : vector<1x8x256xf32>, i32 -> vector<1x8x256xf32>
    %3 = vector.extract_strided_slice %1 {offsets = [0, 0], sizes = [1, 256], strides = [1, 1]} : vector<9x256xf32> to vector<1x256xf32>
    %4 = vector.shape_cast %3 : vector<1x256xf32> to vector<1x1x256xf32>
    %5 = vector.broadcast %4 : vector<1x1x256xf32> to vector<1x8x256xf32>
    %6 = arith.mulf %2, %5 : vector<1x8x256xf32>
    %c16_i32 = arith.constant 16 : i32
    %7 = tpu.dynamic_rotate %0 by %c16_i32 dim 2 : vector<1x8x256xf32>, i32 -> vector<1x8x256xf32>
    %8 = vector.extract_strided_slice %1 {offsets = [1, 0], sizes = [1, 256], strides = [1, 1]} : vector<9x256xf32> to vector<1x256xf32>
    %9 = vector.shape_cast %8 : vector<1x256xf32> to vector<1x1x256xf32>
    %10 = vector.broadcast %9 : vector<1x1x256xf32> to vector<1x8x256xf32>
    %11 = arith.mulf %7, %10 : vector<1x8x256xf32>
    %c15_i32 = arith.constant 15 : i32
    %12 = tpu.dynamic_rotate %0 by %c15_i32 dim 2 : vector<1x8x256xf32>, i32 -> vector<1x8x256xf32>
    %13 = vector.extract_strided_slice %1 {offsets = [2, 0], sizes = [1, 256], strides = [1, 1]} : vector<9x256xf32> to vector<1x256xf32>
    %14 = vector.shape_cast %13 : vector<1x256xf32> to vector<1x1x256xf32>
    %15 = vector.broadcast %14 : vector<1x1x256xf32> to vector<1x8x256xf32>
    %16 = arith.mulf %12, %15 : vector<1x8x256xf32>
    %c1_i32 = arith.constant 1 : i32
    %17 = tpu.dynamic_rotate %0 by %c1_i32 dim 2 : vector<1x8x256xf32>, i32 -> vector<1x8x256xf32>
    %18 = vector.extract_strided_slice %1 {offsets = [3, 0], sizes = [1, 256], strides = [1, 1]} : vector<9x256xf32> to vector<1x256xf32>
    %19 = vector.shape_cast %18 : vector<1x256xf32> to vector<1x1x256xf32>
    %20 = vector.broadcast %19 : vector<1x1x256xf32> to vector<1x8x256xf32>
    %21 = arith.mulf %17, %20 : vector<1x8x256xf32>
    %c255_i32 = arith.constant 255 : i32
    %22 = tpu.dynamic_rotate %0 by %c255_i32 dim 2 : vector<1x8x256xf32>, i32 -> vector<1x8x256xf32>
    %23 = vector.extract_strided_slice %1 {offsets = [5, 0], sizes = [1, 256], strides = [1, 1]} : vector<9x256xf32> to vector<1x256xf32>
    %24 = vector.shape_cast %23 : vector<1x256xf32> to vector<1x1x256xf32>
    %25 = vector.broadcast %24 : vector<1x1x256xf32> to vector<1x8x256xf32>
    %26 = arith.mulf %22, %25 : vector<1x8x256xf32>
    %c241_i32 = arith.constant 241 : i32
    %27 = tpu.dynamic_rotate %0 by %c241_i32 dim 2 : vector<1x8x256xf32>, i32 -> vector<1x8x256xf32>
    %28 = vector.extract_strided_slice %1 {offsets = [6, 0], sizes = [1, 256], strides = [1, 1]} : vector<9x256xf32> to vector<1x256xf32>
    %29 = vector.shape_cast %28 : vector<1x256xf32> to vector<1x1x256xf32>
    %30 = vector.broadcast %29 : vector<1x1x256xf32> to vector<1x8x256xf32>
    %31 = arith.mulf %27, %30 : vector<1x8x256xf32>
    %c240_i32 = arith.constant 240 : i32
    %32 = tpu.dynamic_rotate %0 by %c240_i32 dim 2 : vector<1x8x256xf32>, i32 -> vector<1x8x256xf32>
    %33 = vector.extract_strided_slice %1 {offsets = [7, 0], sizes = [1, 256], strides = [1, 1]} : vector<9x256xf32> to vector<1x256xf32>
    %34 = vector.shape_cast %33 : vector<1x256xf32> to vector<1x1x256xf32>
    %35 = vector.broadcast %34 : vector<1x1x256xf32> to vector<1x8x256xf32>
    %36 = arith.mulf %32, %35 : vector<1x8x256xf32>
    %c239_i32 = arith.constant 239 : i32
    %37 = tpu.dynamic_rotate %0 by %c239_i32 dim 2 : vector<1x8x256xf32>, i32 -> vector<1x8x256xf32>
    %38 = vector.extract_strided_slice %1 {offsets = [8, 0], sizes = [1, 256], strides = [1, 1]} : vector<9x256xf32> to vector<1x256xf32>
    %39 = vector.shape_cast %38 : vector<1x256xf32> to vector<1x1x256xf32>
    %40 = vector.broadcast %39 : vector<1x1x256xf32> to vector<1x8x256xf32>
    %41 = arith.mulf %37, %40 : vector<1x8x256xf32>
    %42 = tpu.concatenate %6, %11, %16, %21, %0, %26, %31, %36, %41 in 1 : vector<1x8x256xf32>, vector<1x8x256xf32>, vector<1x8x256xf32>, vector<1x8x256xf32>, vector<1x8x256xf32>, vector<1x8x256xf32>, vector<1x8x256xf32>, vector<1x8x256xf32>, vector<1x8x256xf32> -> vector<1x72x256xf32>
    %c0_4 = arith.constant 0 : index
    %c0_5 = arith.constant 0 : index
    %43 = vector.load %arg2[%c0_4, %c0_5] : memref<32x72xf32, #tpu.memory_space<vmem>>, vector<32x72xf32>
    %44 = vector.shape_cast %42 : vector<1x72x256xf32> to vector<72x256xf32>
    %cst = arith.constant dense<0.000000e+00> : vector<32x256xf32>
    %45 = tpu.matmul %43, %44, %cst {dimension_numbers = #tpu.dot_dimension_numbers<[1], [0], [0], [1], [0, 0, 1, 1], [], []>} : vector<32x72xf32>, vector<72x256xf32>, vector<32x256xf32> -> vector<32x256xf32>
    %46 = vector.shape_cast %45 : vector<32x256xf32> to vector<1x32x256xf32>
    %c0_6 = arith.constant 0 : index
    %c0_7 = arith.constant 0 : index
    %47 = vector.load %arg3[%c0_6, %c0_7] : memref<32x1xf32, #tpu.memory_space<vmem>>, vector<32x1xf32>
    %48 = vector.shape_cast %47 : vector<32x1xf32> to vector<1x32x1xf32>
    %49 = vector.broadcast %48 : vector<1x32x1xf32> to vector<1x32x256xf32>
    %50 = arith.addf %46, %49 : vector<1x32x256xf32>
    %cst_8 = arith.constant 0.000000e+00 : f32
    %51 = vector.broadcast %cst_8 : f32 to vector<1x32x256xf32>
    %52 = arith.maximumf %50, %51 : vector<1x32x256xf32>
    %c0_9 = arith.constant 0 : index
    %c0_10 = arith.constant 0 : index
    %53 = vector.load %arg4[%c0_9, %c0_10] : memref<32x9xf32, #tpu.memory_space<vmem>>, vector<32x9xf32>
    %cst_11 = arith.constant 0.000000e+00 : f32
    %54 = vector.broadcast %cst_11 : f32 to vector<1x32x256xf32>
    %c17_i32_12 = arith.constant 17 : i32
    %55 = tpu.dynamic_rotate %52 by %c17_i32_12 dim 2 : vector<1x32x256xf32>, i32 -> vector<1x32x256xf32>
    %56 = vector.extract_strided_slice %1 {offsets = [0, 0], sizes = [1, 256], strides = [1, 1]} : vector<9x256xf32> to vector<1x256xf32>
    %57 = vector.shape_cast %56 : vector<1x256xf32> to vector<1x1x256xf32>
    %58 = vector.broadcast %57 : vector<1x1x256xf32> to vector<1x32x256xf32>
    %59 = arith.mulf %55, %58 : vector<1x32x256xf32>
    %60 = vector.extract_strided_slice %53 {offsets = [0, 0], sizes = [32, 1], strides = [1, 1]} : vector<32x9xf32> to vector<32x1xf32>
    %61 = vector.shape_cast %60 : vector<32x1xf32> to vector<1x32x1xf32>
    %62 = vector.broadcast %61 : vector<1x32x1xf32> to vector<1x32x256xf32>
    %63 = arith.mulf %59, %62 : vector<1x32x256xf32>
    %64 = arith.addf %54, %63 : vector<1x32x256xf32>
    %c16_i32_13 = arith.constant 16 : i32
    %65 = tpu.dynamic_rotate %52 by %c16_i32_13 dim 2 : vector<1x32x256xf32>, i32 -> vector<1x32x256xf32>
    %66 = vector.extract_strided_slice %1 {offsets = [1, 0], sizes = [1, 256], strides = [1, 1]} : vector<9x256xf32> to vector<1x256xf32>
    %67 = vector.shape_cast %66 : vector<1x256xf32> to vector<1x1x256xf32>
    %68 = vector.broadcast %67 : vector<1x1x256xf32> to vector<1x32x256xf32>
    %69 = arith.mulf %65, %68 : vector<1x32x256xf32>
    %70 = vector.extract_strided_slice %53 {offsets = [0, 1], sizes = [32, 1], strides = [1, 1]} : vector<32x9xf32> to vector<32x1xf32>
    %71 = vector.shape_cast %70 : vector<32x1xf32> to vector<1x32x1xf32>
    %72 = vector.broadcast %71 : vector<1x32x1xf32> to vector<1x32x256xf32>
    %73 = arith.mulf %69, %72 : vector<1x32x256xf32>
    %74 = arith.addf %64, %73 : vector<1x32x256xf32>
    %c15_i32_14 = arith.constant 15 : i32
    %75 = tpu.dynamic_rotate %52 by %c15_i32_14 dim 2 : vector<1x32x256xf32>, i32 -> vector<1x32x256xf32>
    %76 = vector.extract_strided_slice %1 {offsets = [2, 0], sizes = [1, 256], strides = [1, 1]} : vector<9x256xf32> to vector<1x256xf32>
    %77 = vector.shape_cast %76 : vector<1x256xf32> to vector<1x1x256xf32>
    %78 = vector.broadcast %77 : vector<1x1x256xf32> to vector<1x32x256xf32>
    %79 = arith.mulf %75, %78 : vector<1x32x256xf32>
    %80 = vector.extract_strided_slice %53 {offsets = [0, 2], sizes = [32, 1], strides = [1, 1]} : vector<32x9xf32> to vector<32x1xf32>
    %81 = vector.shape_cast %80 : vector<32x1xf32> to vector<1x32x1xf32>
    %82 = vector.broadcast %81 : vector<1x32x1xf32> to vector<1x32x256xf32>
    %83 = arith.mulf %79, %82 : vector<1x32x256xf32>
    %84 = arith.addf %74, %83 : vector<1x32x256xf32>
    %c1_i32_15 = arith.constant 1 : i32
    %85 = tpu.dynamic_rotate %52 by %c1_i32_15 dim 2 : vector<1x32x256xf32>, i32 -> vector<1x32x256xf32>
    %86 = vector.extract_strided_slice %1 {offsets = [3, 0], sizes = [1, 256], strides = [1, 1]} : vector<9x256xf32> to vector<1x256xf32>
    %87 = vector.shape_cast %86 : vector<1x256xf32> to vector<1x1x256xf32>
    %88 = vector.broadcast %87 : vector<1x1x256xf32> to vector<1x32x256xf32>
    %89 = arith.mulf %85, %88 : vector<1x32x256xf32>
    %90 = vector.extract_strided_slice %53 {offsets = [0, 3], sizes = [32, 1], strides = [1, 1]} : vector<32x9xf32> to vector<32x1xf32>
    %91 = vector.shape_cast %90 : vector<32x1xf32> to vector<1x32x1xf32>
    %92 = vector.broadcast %91 : vector<1x32x1xf32> to vector<1x32x256xf32>
    %93 = arith.mulf %89, %92 : vector<1x32x256xf32>
    %94 = arith.addf %84, %93 : vector<1x32x256xf32>
    %95 = vector.extract_strided_slice %53 {offsets = [0, 4], sizes = [32, 1], strides = [1, 1]} : vector<32x9xf32> to vector<32x1xf32>
    %96 = vector.shape_cast %95 : vector<32x1xf32> to vector<1x32x1xf32>
    %97 = vector.broadcast %96 : vector<1x32x1xf32> to vector<1x32x256xf32>
    %98 = arith.mulf %52, %97 : vector<1x32x256xf32>
    %99 = arith.addf %94, %98 : vector<1x32x256xf32>
    %c255_i32_16 = arith.constant 255 : i32
    %100 = tpu.dynamic_rotate %52 by %c255_i32_16 dim 2 : vector<1x32x256xf32>, i32 -> vector<1x32x256xf32>
    %101 = vector.extract_strided_slice %1 {offsets = [5, 0], sizes = [1, 256], strides = [1, 1]} : vector<9x256xf32> to vector<1x256xf32>
    %102 = vector.shape_cast %101 : vector<1x256xf32> to vector<1x1x256xf32>
    %103 = vector.broadcast %102 : vector<1x1x256xf32> to vector<1x32x256xf32>
    %104 = arith.mulf %100, %103 : vector<1x32x256xf32>
    %105 = vector.extract_strided_slice %53 {offsets = [0, 5], sizes = [32, 1], strides = [1, 1]} : vector<32x9xf32> to vector<32x1xf32>
    %106 = vector.shape_cast %105 : vector<32x1xf32> to vector<1x32x1xf32>
    %107 = vector.broadcast %106 : vector<1x32x1xf32> to vector<1x32x256xf32>
    %108 = arith.mulf %104, %107 : vector<1x32x256xf32>
    %109 = arith.addf %99, %108 : vector<1x32x256xf32>
    %c241_i32_17 = arith.constant 241 : i32
    %110 = tpu.dynamic_rotate %52 by %c241_i32_17 dim 2 : vector<1x32x256xf32>, i32 -> vector<1x32x256xf32>
    %111 = vector.extract_strided_slice %1 {offsets = [6, 0], sizes = [1, 256], strides = [1, 1]} : vector<9x256xf32> to vector<1x256xf32>
    %112 = vector.shape_cast %111 : vector<1x256xf32> to vector<1x1x256xf32>
    %113 = vector.broadcast %112 : vector<1x1x256xf32> to vector<1x32x256xf32>
    %114 = arith.mulf %110, %113 : vector<1x32x256xf32>
    %115 = vector.extract_strided_slice %53 {offsets = [0, 6], sizes = [32, 1], strides = [1, 1]} : vector<32x9xf32> to vector<32x1xf32>
    %116 = vector.shape_cast %115 : vector<32x1xf32> to vector<1x32x1xf32>
    %117 = vector.broadcast %116 : vector<1x32x1xf32> to vector<1x32x256xf32>
    %118 = arith.mulf %114, %117 : vector<1x32x256xf32>
    %119 = arith.addf %109, %118 : vector<1x32x256xf32>
    %c240_i32_18 = arith.constant 240 : i32
    %120 = tpu.dynamic_rotate %52 by %c240_i32_18 dim 2 : vector<1x32x256xf32>, i32 -> vector<1x32x256xf32>
    %121 = vector.extract_strided_slice %1 {offsets = [7, 0], sizes = [1, 256], strides = [1, 1]} : vector<9x256xf32> to vector<1x256xf32>
    %122 = vector.shape_cast %121 : vector<1x256xf32> to vector<1x1x256xf32>
    %123 = vector.broadcast %122 : vector<1x1x256xf32> to vector<1x32x256xf32>
    %124 = arith.mulf %120, %123 : vector<1x32x256xf32>
    %125 = vector.extract_strided_slice %53 {offsets = [0, 7], sizes = [32, 1], strides = [1, 1]} : vector<32x9xf32> to vector<32x1xf32>
    %126 = vector.shape_cast %125 : vector<32x1xf32> to vector<1x32x1xf32>
    %127 = vector.broadcast %126 : vector<1x32x1xf32> to vector<1x32x256xf32>
    %128 = arith.mulf %124, %127 : vector<1x32x256xf32>
    %129 = arith.addf %119, %128 : vector<1x32x256xf32>
    %c239_i32_19 = arith.constant 239 : i32
    %130 = tpu.dynamic_rotate %52 by %c239_i32_19 dim 2 : vector<1x32x256xf32>, i32 -> vector<1x32x256xf32>
    %131 = vector.extract_strided_slice %1 {offsets = [8, 0], sizes = [1, 256], strides = [1, 1]} : vector<9x256xf32> to vector<1x256xf32>
    %132 = vector.shape_cast %131 : vector<1x256xf32> to vector<1x1x256xf32>
    %133 = vector.broadcast %132 : vector<1x1x256xf32> to vector<1x32x256xf32>
    %134 = arith.mulf %130, %133 : vector<1x32x256xf32>
    %135 = vector.extract_strided_slice %53 {offsets = [0, 8], sizes = [32, 1], strides = [1, 1]} : vector<32x9xf32> to vector<32x1xf32>
    %136 = vector.shape_cast %135 : vector<32x1xf32> to vector<1x32x1xf32>
    %137 = vector.broadcast %136 : vector<1x32x1xf32> to vector<1x32x256xf32>
    %138 = arith.mulf %134, %137 : vector<1x32x256xf32>
    %139 = arith.addf %129, %138 : vector<1x32x256xf32>
    %cst_20 = arith.constant dense<0.000000e+00> : vector<1x256xf32>
    %140 = vector.multi_reduction <add>, %139, %cst_20 [1] : vector<1x32x256xf32> to vector<1x256xf32>
    %141 = vector.shape_cast %140 : vector<1x256xf32> to vector<1x1x256xf32>
    %c0_21 = arith.constant 0 : index
    %c0_22 = arith.constant 0 : index
    %142 = memref.load %arg6[%c0_21, %c0_22] : memref<1x1xf32, #tpu.memory_space<smem>>
    %143 = vector.broadcast %142 : f32 to vector<1x1x256xf32>
    %144 = arith.addf %141, %143 : vector<1x1x256xf32>
    %c0_23 = arith.constant 0 : index
    %c0_24 = arith.constant 0 : index
    %c0_25 = arith.constant 0 : index
    %145 = vector.load %arg7[%c0_23, %c0_24, %c0_25] : memref<1x1x256xf32, #tpu.memory_space<vmem>>, vector<1x1x256xf32>
    tpu.vector_store %arg7[%c0_23, %c0_24, %c0_25], %144 {strides = array<i32>} : memref<1x1x256xf32, #tpu.memory_space<vmem>>, vector<1x1x256xf32>,
    return
  }
  func.func @transform_0(%arg0: i32) -> (i32, i32, i32) {
    %c0_i32 = arith.constant 0 : i32
    %c0_i32_0 = arith.constant 0 : i32
    %c0_i32_1 = arith.constant 0 : i32
    return %arg0, %c0_i32, %c0_i32_0 : i32, i32, i32
  }
  func.func @transform_1(%arg0: i32) -> (i32, i32) {
    %c0_i32 = arith.constant 0 : i32
    %c0_i32_0 = arith.constant 0 : i32
    %c0_i32_1 = arith.constant 0 : i32
    return %c0_i32, %c0_i32_0 : i32, i32
  }
  func.func @transform_2(%arg0: i32) -> (i32, i32) {
    %c0_i32 = arith.constant 0 : i32
    %c0_i32_0 = arith.constant 0 : i32
    %c0_i32_1 = arith.constant 0 : i32
    return %c0_i32, %c0_i32_0 : i32, i32
  }
  func.func @transform_3(%arg0: i32) -> (i32, i32) {
    %c0_i32 = arith.constant 0 : i32
    %c0_i32_0 = arith.constant 0 : i32
    %c0_i32_1 = arith.constant 0 : i32
    return %c0_i32, %c0_i32_0 : i32, i32
  }
  func.func @transform_4(%arg0: i32) -> (i32, i32) {
    %c0_i32 = arith.constant 0 : i32
    %c0_i32_0 = arith.constant 0 : i32
    %c0_i32_1 = arith.constant 0 : i32
    return %c0_i32, %c0_i32_0 : i32, i32
  }
  func.func @transform_5(%arg0: i32) -> (i32, i32) {
    %c0_i32 = arith.constant 0 : i32
    %c0_i32_0 = arith.constant 0 : i32
    %c0_i32_1 = arith.constant 0 : i32
    return %c0_i32, %c0_i32_0 : i32, i32
  }
  func.func @transform_6(%arg0: i32) -> (i32, i32, i32) {
    %c0_i32 = arith.constant 0 : i32
    %c0_i32_0 = arith.constant 0 : i32
    %c0_i32_1 = arith.constant 0 : i32
    return %arg0, %c0_i32, %c0_i32_0 : i32, i32, i32
  }
}

</mosaic_0001>

<bundles_post_ra>
// kernel: tpu_custom_call.1
= control target key start
LH: loop header
LB: loop body
LE: loop exit
PB: predicated region body
PF: predicated region fallthrough
CT: control target
= control target key end

     0   :  { %s2450_s0 = inlined_call_operand.vmem [shape: f32[2,8,256], index: 0, kind: input, shape index: {}]   ;;  %s2451_s1 = inlined_call_operand.vmem [shape: f32[32,72], index: 1, kind: input, shape index: {}]   ;;  %s2452_s2 = inlined_call_operand.vmem [shape: f32[32,1], index: 2, kind: input, shape index: {}]   ;;  %s2453_s3 = inlined_call_operand.vmem [shape: f32[32,9], index: 3, kind: input, shape index: {}]   ;;  %s2454_s4 = inlined_call_operand.vmem [shape: f32[9,256], index: 4, kind: input, shape index: {}]   ;;  %s2455_s5 = inlined_call_operand.<no memory space> [shape: f32[1,1], index: 5, kind: input, shape index: {}]   ;;  %s2456_s6 = inlined_call_operand.hbm [shape: f32[2,1,256], index: 6, kind: output, shape index: {}]  }
   0x1   :  { %11 = sst [smem:[#allocation2]] %s2455_s5 }
   0x2   :  { %12 = vsyncpa [#allocation4], 0 }
   0x3   :  { %14 = vsyncpa [#allocation4 + $0x1], 0  ;;  %s1460_s23 = smov 0   ;;  %s1462_s24 = smov 0  }
   0x4   :  { %s1464_s25 = smov 0   ;;  %s1466_s26 = smov 0  }
   0x5 LB: > { %s1481_s5 = sadd.s32 4294967295, %s1400_s26   ;;  %s1212_s27 = sadd.s32 4294967294, %s1400_s26   ;;  %s1400_s26 = sphi %s1466_s26, %s2596_s26   ;;  %s1396_s25 = sphi %s1464_s25, %s2595_s25   ;;  %s1392_s24 = sphi %s1462_s24, %s2594_s24   ;;  %s1388_s23 = sphi %s1460_s23, %s2593_s23  }
   0x6   : > { %s1485_s28 = sadd.s32 1, %s1400_s26   ;;  %s158_s29 = sadd.s32 1, %s1396_s25 }
   0x7   : > { %s155_s30 = ssub.s32 %s1400_s26, %s1485_s28  ;;  %p168_p0 = scmp.ne.s32.totalorder %s1396_s25, %s1392_s24 }
   0x8   : > { %p156_p1 = scmp.eq.s32.totalorder %s155_s30, 0  ;;  %p169_p2 = scmp.eq.s32.totalorder %s1481_s5, 1 }
   0x9   : > { %p174_p3 = scmp.ne.s32.totalorder %s1392_s24, %s1388_s23  ;;  %p175_p4 = scmp.eq.s32.totalorder %s1212_s27, 1 }
   0xa   : > { %s1496_s7 = scalar_select %p156_p1, %s1396_s25, %s158_s29  }
   0xb   : > { %p1498_p5 = por %p169_p2, %p168_p0  ;;  %p1502_p6 = por %p175_p4, %p174_p3 }
   0xc   : > { %p1215_p7 = scmp.ge.s32.totalorder %s1400_s26, 1  ;;  %p216_p8 = scmp.lt.s32.totalorder %s1400_s26, 3 }
   0xe   : > { %p217_p9 = pnand %p1215_p7, %p216_p8 }
  0x10   : > { %220 = sbr.rel (%p217_p9) target bundleno = 683 (0x2ab), region = 44 }
  0x17   : > { %p246_p10 = scmp.lt.s32.totalorder %s1481_s5, 1  ;;  %s1402_s15 = smov 16   ;;  %v1408_v2 = vmov 0.0   ;;  %v1410_v3 = vmov 0   ;;  %v502_v4 = vld [vmem:[%s2452_s2 + $0x8] sm:$0xff]  ;;  %v501_v5 = vld [vmem:[%s2452_s2] sm:$0xff]  ;;  %v2461_v20 = vlaneseq }
  0x18   : > { %s1403_s16 = smov 17   ;;  %s1404_s17 = smov 15   ;;  %476 = vmatprep.mubr.f32.mxu0 %v1408_v2  ;;  %488 = vmatprep.mubr.f32.mxu1 %v1408_v2  ;;  %v503_v6 = vld [vmem:[%s2452_s2 + $0x10] sm:$0xff]  ;;  %v504_v7 = vld [vmem:[%s2452_s2 + $0x18] sm:$0xff]  ;;  %v1566_v8 = vld [vmem:[%s2453_s3] sm:$0xff]  ;;  %v1412_v12 = vmov 1  }
  0x19   : > { %s247_s10 = scalar_select %p246_p10, %s1481_s5, 1  ;;  %1317 = vset.pattern.permute.xlu1 %v1410_v3  ;;  %1316 = vset.pattern.permute.xlu0 %v1410_v3  ;;  %v1571_v9 = vld [vmem:[%s2453_s3 + $0x8] sm:$0xff]  ;;  %v1578_v10 = vld [vmem:[%s2453_s3 + $0x10] sm:$0xff]  ;;  %v1583_v11 = vld [vmem:[%s2453_s3 + $0x18] sm:$0xff]  ;;  %v1413_v13 = vmov 2   ;;  %v1414_v14 = vmov 3  }
  0x1a   : > { %s1405_s18 = smov 1   ;;  %s2459_s19 = smov 127   ;;  %v1415_v15 = vmov 4   ;;  %v1416_v16 = vmov 5   ;;  %v1417_v17 = vmov 6   ;;  %v1418_v18 = vmov 8  }
  0x1b   : > { %s1230_s11 = sshll.u32 %s247_s10, 4  ;;  %s2457_s20 = smov 113   ;;  %v1419_v19 = vmov 7   ;;  %v1616_v21 = vshrl.u32 %v2461_v20, 7  ;;  %v1619_v22 = vand.u32 127, %v2461_v20  ;;  %v1627_v25 = vld [vmem:[%s2454_s4] sm:$0xff] }
  0x1c   : > { %s250_s14 = scalar_lea.vmem %s2450_s0, %s1230_s11  ;;  %s1409_s21 = smov 112   ;;  %v1632_v26 = vld [vmem:[%s2454_s4 + $0x8] sm:$0xff]  ;;  %vm399_vm8 = vcmask 588800  }
  0x1d   : > { %v1513_v0 = vld [vmem:[%s250_s14] sm:$0xff]  ;;  %v1519_v1 = vld [vmem:[%s250_s14 + $0x8] sm:$0xff]  ;;  %s1411_s22 = smov 111   ;;  %2508 = vst [vmem:[#allocation6_spill] sm:$0xff] %v1616_v21  ;;  %v268_v23 = vsub.s32 0, %v1616_v21  ;;  %v285_v24 = vsub.s32 1, %v1616_v21 }
  0x1e   : > { %276 = vrot.lane.b32.xlu1 %v1513_v0, %s1402_s15  ;;  %257 = vrot.lane.b32.xlu0 %v1513_v0, %s1403_s16  ;;  %vm280_vm0 = vcmp.lt.s32.totalorder %v1619_v22, 16  ;;  %vm263_vm1 = vcmp.lt.s32.totalorder %v1619_v22, 17  ;;  %v302_v35 = vsub.s32 2, %v1616_v21  ;;  %v319_v36 = vsub.s32 3, %v1616_v21  ;;  %s2515_s30 = smov 127   ;;  %s2518_s10 = smov 113  }
  0x1f   : > { %v1637_v29 = vrot.slane %v1632_v26, %v268_v23  ;;  %v1640_v30 = vrot.slane %v1632_v26, %v285_v24  ;;  %v1643_v31 = vrot.slane %v1627_v25, %v268_v23  ;;  %v1646_v32 = vrot.slane %v1627_v25, %v285_v24 }
  0x20   : > { %vm297_vm2 = vcmp.lt.s32.totalorder %v1619_v22, 15  ;;  %v1666_v49 = vrot.slane %v1627_v25, %v302_v35  ;;  %v336_v50 = vsub.s32 5, %v1616_v21  ;;  %v1670_v51 = vrot.slane %v1632_v26, %v302_v35 }
  0x21   : > { %vm314_vm3 = vcmp.lt.s32.totalorder %v1619_v22, 1  ;;  %v1674_v52 = vrot.slane %v1627_v25, %v319_v36  ;;  %v1677_v53 = vrot.slane %v1632_v26, %v319_v36  ;;  %vm331_vm4 = vcmp.lt.s32.totalorder %v1619_v22, 127 }
  0x22   : > { %278 = vrot.lane.b32.xlu1 %v1519_v1, %s1402_s15  ;;  %259 = vrot.lane.b32.xlu0 %v1519_v1, %s1403_s16  ;;  %2509 = vst [vmem:[#allocation7_spill] sm:$0xff] %v1666_v49  ;;  %2510 = vst [vmem:[#allocation8_spill] sm:$0xff] %v1670_v51  ;;  %v1690_v60 = vrot.slane %v1627_v25, %v336_v50  ;;  %v1693_v61 = vrot.slane %v1632_v26, %v336_v50  ;;  %vm348_vm5 = vcmp.lt.s32.totalorder %v1619_v22, 113  ;;  %v397_v50 = vld [vmem:[%s2451_s1 + $0x10] sm:$0xff] }
  0x23   : > { %vm365_vm6 = vcmp.lt.s32.totalorder %v1619_v22, 112  ;;  %vm382_vm7 = vcmp.lt.s32.totalorder %v1619_v22, 111 }
  0x26   : > { %295 = vrot.lane.b32.xlu1 %v1519_v1, %s1404_s17  ;;  %293 = vrot.lane.b32.xlu0 %v1513_v0, %s1404_s17 }
  0x2a   : > { %312 = vrot.lane.b32.xlu1 %v1519_v1, %s1405_s18  ;;  %310 = vrot.lane.b32.xlu0 %v1513_v0, %s1405_s18 }
  0x2e   : > { %329 = vrot.lane.b32.xlu1 %v1519_v1, %s2459_s19  ;;  %327 = vrot.lane.b32.xlu0 %v1513_v0, %s2459_s19 }
  0x32   : > { %346 = vrot.lane.b32.xlu1 %v1519_v1, %s2457_s20  ;;  %344 = vrot.lane.b32.xlu0 %v1513_v0, %s2457_s20 }
  0x36   : > { %363 = vrot.lane.b32.xlu1 %v1519_v1, %s1409_s21  ;;  %361 = vrot.lane.b32.xlu0 %v1513_v0, %s1409_s21 }
  0x3a   : > { %380 = vrot.lane.b32.xlu1 %v1519_v1, %s1411_s22  ;;  %378 = vrot.lane.b32.xlu0 %v1513_v0, %s1411_s22 }
  0x3e   : > { %512 = vperm.xlu1 %1317, %v502_v4   ;;  %507 = vperm.xlu0 %1316, %v501_v5  }
  0x42   : > { %517 = vperm.xlu1 %1317, %v503_v6   ;;  %522 = vperm.xlu0 %1316, %v504_v7  }
  0x46   : > { %579 = vperm.xlu1 %1317, %v1566_v8   ;;  %584 = vperm.xlu0 %1316, %v1571_v9  }
  0x4a   : > { %589 = vperm.xlu1 %1317, %v1578_v10   ;;  %594 = vperm.xlu0 %1316, %v1583_v11  }
  0x4e   : > { %1318 = vset.pattern.permute.xlu1 %v1412_v12  ;;  %1319 = vset.pattern.permute.xlu0 %v1412_v12 }
  0x4f   : > { %646 = vperm.xlu1 %1318, %v1566_v8   ;;  %650 = vperm.xlu0 %1319, %v1571_v9  }
  0x53   : > { %654 = vperm.xlu1 %1318, %v1578_v10   ;;  %1320 = vset.pattern.permute.xlu0 %v1413_v13 }
  0x54   : > { %710 = vperm.xlu0 %1320, %v1566_v8  }
  0x57   : > { %658 = vperm.xlu1 %1318, %v1583_v11  }
  0x58   : > { %722 = vperm.xlu0 %1320, %v1583_v11  }
  0x5b   : > { %1321 = vset.pattern.permute.xlu1 %v1413_v13 }
  0x5c   : > { %714 = vperm.xlu1 %1321, %v1571_v9   ;;  %1323 = vset.pattern.permute.xlu0 %v1414_v14 }
  0x5d   : > { %778 = vperm.xlu0 %1323, %v1571_v9  }
  0x60   : > { %718 = vperm.xlu1 %1321, %v1578_v10  }
  0x61   : > { %1324 = vset.pattern.permute.xlu0 %v1415_v15 }
  0x62   : > { %806 = vperm.xlu0 %1324, %v1566_v8  }
  0x64   : > { %1322 = vset.pattern.permute.xlu1 %v1414_v14 }
  0x65   : > { %774 = vperm.xlu1 %1322, %v1566_v8  }
  0x66   : > { %818 = vperm.xlu0 %1324, %v1583_v11  }
  0x69   : > { %782 = vperm.xlu1 %1322, %v1578_v10  }
  0x6a   : > { %1327 = vset.pattern.permute.xlu0 %v1416_v16 }
  0x6b   : > { %874 = vperm.xlu0 %1327, %v1571_v9  }
  0x6d   : > { %786 = vperm.xlu1 %1322, %v1583_v11  }
  0x6f   : > { %1329 = vset.pattern.permute.xlu0 %v1417_v17 }
  0x70   : > { %938 = vperm.xlu0 %1329, %v1571_v9  }
  0x71   : > { %1325 = vset.pattern.permute.xlu1 %v1415_v15 }
  0x72   : > { %810 = vperm.xlu1 %1325, %v1571_v9  }
  0x74   : > { %1335 = vset.pattern.permute.xlu0 %v1418_v18 }
  0x75   : > { %1066 = vperm.xlu0 %1335, %v1571_v9  }
  0x76   : > { %814 = vperm.xlu1 %1325, %v1578_v10  }
  0x79   : > { %1336 = vset.pattern.permute.xlu0 %v1419_v19 }
  0x7a   : > { %1326 = vset.pattern.permute.xlu1 %v1416_v16  ;;  %998 = vperm.xlu0 %1336, %v1566_v8  }
  0x7b   : > { %870 = vperm.xlu1 %1326, %v1566_v8  }
  0x7e   : > { %1006 = vperm.xlu0 %1336, %v1578_v10  }
  0x7f   : > { %878 = vperm.xlu1 %1326, %v1578_v10  }
  0x82   : > { %1010 = vperm.xlu0 %1336, %v1583_v11  }
  0x83   : > { %1328 = vset.pattern.permute.xlu1 %v1417_v17 }
  0x84   : > { %934 = vperm.xlu1 %1328, %v1566_v8  }
  0x86   : > { %1337 = vset.pattern.permute.xlu0 %v1418_v18 }
  0x88   : > { %1330 = vset.pattern.permute.xlu1 %v1416_v16  ;;  %v370_v16 = vsub.s32 7, %v1616_v21 }
  0x89   : > { %882 = vperm.xlu1 %1330, %v1583_v11  }
  0x8d   : > { %1331 = vset.pattern.permute.xlu1 %v1417_v17 }
  0x8e   : > { %942 = vperm.xlu1 %1331, %v1578_v10  }
  0x90   : > { %v277_v27 = vpop.permute.xlu1 %276  ;;  %v258_v28 = vpop.permute.xlu0 %257 }
  0x92   : > { %1332 = vset.pattern.permute.xlu1 %v1419_v19 }
  0x93   : > { %1002 = vperm.xlu1 %1332, %v1571_v9  }
  0x94   : > { %v279_v33 = vpop.permute.xlu1 %278  ;;  %v260_v34 = vpop.permute.xlu0 %259 }
  0x95   : > { %v281_v37 = vsel %vm280_vm0, %v277_v27, %v279_v33  ;;  %v282_v38 = vsel %vm280_vm0, %v279_v33, %v277_v27  ;;  %v264_v39 = vsel %vm263_vm1, %v258_v28, %v260_v34  ;;  %v265_v40 = vsel %vm263_vm1, %v260_v34, %v258_v28 }
  0x96   : > { %v275_v41 = vmul.f32 %v1637_v29, %v264_v39  ;;  %v292_v42 = vmul.f32 %v1640_v30, %v281_v37  ;;  %v274_v43 = vmul.f32 %v1643_v31, %v265_v40  ;;  %v291_v44 = vmul.f32 %v1646_v32, %v282_v38  ;;  %v1742_v38 = vld [vmem:[%s2454_s4 + $0x18] ss:$0 sm:$0xff] }
  0x97   : > { %1333 = vset.pattern.permute.xlu1 %v1417_v17  ;;  %v1721_v27 = vrot.slane %v1627_v25, %v370_v16  ;;  %v1724_v28 = vrot.slane %v1632_v26, %v370_v16  ;;  %2511 = vst [vmem:[#allocation9_spill] sm:$0xff] %v1742_v38 }
  0x98   : > { %v296_v45 = vpop.permute.xlu1 %295  ;;  %v294_v46 = vpop.permute.xlu0 %293  ;;  %v1232_v47 = vpack.c.bf16 %v292_v42, %v275_v41  ;;  %v1234_v48 = vpack.c.bf16 %v291_v44, %v274_v43  ;;  %946 = vperm.xlu1 %1333, %v1583_v11   ;;  %v1747_v41 = vld [vmem:[%s2454_s4 + $0x10] ss:$0 sm:$0xff] }
  0x99   : > { %v298_v54 = vsel %vm297_vm2, %v294_v46, %v296_v45  ;;  %v299_v55 = vsel %vm297_vm2, %v296_v45, %v294_v46  ;;  %2512 = vst [vmem:[#allocation10_spill] sm:$0xff] %v1747_v41 }
  0x9a   : > { %1233 = vmatprep.subr.bf16.mxu0 %v1232_v47  ;;  %1248 = vmatprep.subr.bf16.mxu1 %v1232_v47  ;;  %v308_v62 = vmul.f32 %v1666_v49, %v299_v55  ;;  %v309_v63 = vmul.f32 %v1670_v51, %v298_v54  ;;  %v396_v54 = vld [vmem:[%s2451_s1 + $0x8] sm:$0xff]  ;;  %v398_v55 = vld [vmem:[%s2451_s1 + $0x18] sm:$0xff] }
  0x9b   : > { %1235 = vmatpush1.bf16.msra.mxu0 %v1234_v48  ;;  %1253 = vmatpush1.bf16.msra.mxu1 %v1234_v48  ;;  %v395_v48 = vld [vmem:[%s2451_s1] sm:$0xff] }
  0x9c   : > { %v313_v56 = vpop.permute.xlu1 %312  ;;  %v311_v57 = vpop.permute.xlu0 %310  ;;  %1334 = vset.pattern.permute.xlu1 %v1418_v18 }
  0x9d   : > { %v315_v58 = vsel %vm314_vm3, %v311_v57, %v313_v56  ;;  %v316_v59 = vsel %vm314_vm3, %v313_v56, %v311_v57  ;;  %1062 = vperm.xlu1 %1334, %v1566_v8   ;;  %v353_v8 = vsub.s32 6, %v1616_v21 }
  0x9e   : > { %v325_v3 = vmul.f32 %v1674_v52, %v316_v59  ;;  %v326_v4 = vmul.f32 %v1677_v53, %v315_v58 }
  0x9f   : > { %v1717_v24 = vrot.slane %v1632_v26, %v353_v8 }
  0xa0   : > { %v330_v5 = vpop.permute.xlu1 %329  ;;  %v328_v6 = vpop.permute.xlu0 %327  ;;  %v1236_v7 = vpack.c.bf16 %v326_v4, %v309_v63  ;;  %v1238_v9 = vpack.c.bf16 %v325_v3, %v308_v62 }
  0xa1   : > { %v332_v12 = vsel %vm331_vm4, %v328_v6, %v330_v5  ;;  %v333_v13 = vsel %vm331_vm4, %v330_v5, %v328_v6  ;;  %1070 = vperm.xlu1 %1334, %v1578_v10   ;;  %v1713_v10 = vrot.slane %v1627_v25, %v353_v8 }
  0xa2   : > { %v342_v14 = vmul.f32 %v1690_v60, %v332_v12  ;;  %v343_v15 = vmul.f32 %v1693_v61, %v333_v13  ;;  %1237 = vmatprep.subr.bf16.mxu0 %v1236_v7  ;;  %1249 = vmatprep.subr.bf16.mxu1 %v1236_v7 }
  0xa3   : > { %1239 = vmatpush1.bf16.msra.mxu0 %v1238_v9  ;;  %1254 = vmatpush1.bf16.msra.mxu1 %v1238_v9 }
  0xa4   : > { %v347_v17 = vpop.permute.xlu1 %346  ;;  %v345_v18 = vpop.permute.xlu0 %344  ;;  %v1240_v19 = vpack.c.bf16 %v343_v15, %v1519_v1  ;;  %v1242_v23 = vpack.c.bf16 %v342_v14, %v1513_v0 }
  0xa5   : > { %1074 = vperm.xlu1 %1334, %v1583_v11   ;;  %v349_v0 = vsel %vm348_vm5, %v345_v18, %v347_v17  ;;  %v350_v1 = vsel %vm348_vm5, %v347_v17, %v345_v18 }
  0xa6   : > { %1241 = vmatprep.subr.bf16.mxu0 %v1240_v19  ;;  %1250 = vmatprep.subr.bf16.mxu1 %v1240_v19  ;;  %v359_v26 = vmul.f32 %v1713_v10, %v349_v0  ;;  %v360_v35 = vmul.f32 %v1717_v24, %v350_v1 }
  0xa7   : > { %1243 = vmatpush1.bf16.msra.mxu0 %v1242_v23  ;;  %1255 = vmatpush1.bf16.msra.mxu1 %v1242_v23 }
  0xa8   : > { %v364_v11 = vpop.permute.xlu1 %363  ;;  %v362_v33 = vpop.permute.xlu0 %361 }
  0xa9   : > { %v366_v34 = vsel %vm365_vm6, %v362_v33, %v364_v11  ;;  %v367_v25 = vsel %vm365_vm6, %v364_v11, %v362_v33 }
  0xaa   : > { %v376_v36 = vmul.f32 %v1721_v27, %v366_v34  ;;  %v377_v37 = vmul.f32 %v1724_v28, %v367_v25 }
  0xac   : > { %v381_v39 = vpop.permute.xlu1 %380  ;;  %v1244_v40 = vpack.c.bf16 %v377_v37, %v360_v35  ;;  %v379_v42 = vpop.permute.xlu0 %378  ;;  %v1246_v43 = vpack.c.bf16 %v376_v36, %v359_v26 }
  0xad   : > { %v383_v44 = vsel %vm382_vm7, %v379_v42, %v381_v39  ;;  %v384_v45 = vsel %vm382_vm7, %v381_v39, %v379_v42 }
  0xae   : > { %1245 = vmatprep.subr.bf16.mxu0 %v1244_v40  ;;  %1251 = vmatprep.subr.bf16.mxu1 %v1244_v40  ;;  %v394_v46 = vmul.f32 %v1742_v38, %v384_v45  ;;  %v393_v47 = vmul.f32 %v1747_v41, %v383_v44 }
  0xaf   : > { %1247 = vmatpush1.bf16.msra.mxu0 %v1246_v43  ;;  %1256 = vmatpush1.bf16.msra.mxu1 %v1246_v43 }
  0xb0   : > { %428 = vmatprep.subr.mxu0 %v394_v46  ;;  %1252 = vmatprep.subr.mxu1 %v394_v46 }
  0xb3   : > { %429 = vmatpush1.msra.mxu0 %v393_v47  ;;  %1257 = vmatpush1.msra.mxu1 %v393_v47 }
  0xb4   : > { %1221 = vmatmul.mubr.msk.f32.vlgmr.msra.gmra.mrb[0].mxu0 %vm399_vm8, %v395_v48  ;;  %1223 = vmatmul.mubr.msk.f32.vlgmr.msra.gmra.mrb[0].mxu1 %vm399_vm8, %v397_v50 }
  0xb5   : > { %482 = vmatprep.mubr.f32.mxu0 %v1408_v2  ;;  %494 = vmatprep.mubr.f32.mxu1 %v1408_v2 }
  0xb8   : > { %1222 = vmatmul.mubr.msk.f32.gmra.mrb[2].mxu0 %vm399_vm8, %v396_v54  ;;  %1224 = vmatmul.mubr.msk.f32.gmra.mrb[2].mxu1 %vm399_vm8, %v398_v55 }
  0xbd   : > { %v1769_v56 = vpop.permute.xlu1 %512  ;;  %v508_v62 = vpop.permute.xlu0 %507 }
  0xc1   : > { %v518_v57 = vpop.permute.xlu1 %517  ;;  %v523_v33 = vpop.permute.xlu0 %522 }
  0xc5   : > { %v1771_v58 = vpop.permute.xlu1 %579  ;;  %v1834_v36 = vpop.permute.xlu0 %584 }
  0xc6   : > { %2517 = vst [vmem:[#allocation14_spill] sm:$0xff] %v1834_v36 }
  0xc9   : > { %v1773_v59 = vpop.permute.xlu1 %589  ;;  %v1848_v40 = vpop.permute.xlu0 %594 }
  0xca   : > { %2520 = vst [vmem:[#allocation16_spill] sm:$0xff] %v1848_v40 }
  0xce   : > { %v1783_v14 = vpop.permute.xlu1 %646  ;;  %v1856_v43 = vpop.permute.xlu0 %650 }
  0xcf   : > { %2522 = vst [vmem:[#allocation18_spill] sm:$0xff] %v1856_v43 }
  0xd2   : > { %v1793_v16 = vpop.permute.xlu1 %654 }
  0xd3   : > { %v1868_v45 = vpop.permute.xlu0 %710 }
  0xd6   : > { %v1801_v18 = vpop.permute.xlu1 %658 }
  0xd7   : > { %2513 = vst [vmem:[#allocation11_spill] sm:$0xff] %v1801_v18  ;;  %v1876_v47 = vpop.permute.xlu0 %722 }
  0xd8   : > { %2524 = vst [vmem:[#allocation20_spill] sm:$0xff] %v1876_v47 }
  0xdb   : > { %v1813_v1 = vpop.permute.xlu1 %714 }
  0xdc   : > { %2514 = vst [vmem:[#allocation12_spill] sm:$0xff] %v1813_v1  ;;  %v1888_v50 = vpop.permute.xlu0 %778 }
  0xdd   : > { %2525 = vst [vmem:[#allocation21_spill] sm:$0xff] %v1888_v50 }
  0xdf   : > { %v1821_v11 = vpop.permute.xlu1 %718 }
  0xe1   : > { %v1896_v55 = vpop.permute.xlu0 %806 }
  0xe4   : > { %v1832_v35 = vpop.permute.xlu1 %774 }
  0xe8   : > { %v1844_v39 = vpop.permute.xlu1 %782 }
  0xec   : > { %v1854_v42 = vpop.permute.xlu1 %786 }
  0xed   : > { %2521 = vst [vmem:[#allocation17_spill] sm:$0xff] %v1854_v42 }
  0xf1   : > { %v1864_v44 = vpop.permute.xlu1 %810 }
  0xf2   : > { %2523 = vst [vmem:[#allocation19_spill] sm:$0xff] %v1864_v44 }
  0xf5   : > { %v1874_v46 = vpop.permute.xlu1 %814 }
  0xfa   : > { %v1882_v48 = vpop.permute.xlu1 %870 }
  0xfe   : > { %v1894_v54 = vpop.permute.xlu1 %878 }
 0x187   : > { %v478_v63 = vpop.f32.mrb[0].mxu0  ;;  %v490_v2 = vpop.f32.mrb[0].mxu1 }
 0x188   : > { %v525_v3 = vadd.f32 %v508_v62, %v478_v63  ;;  %v480_v4 = vpop.f32.mrb[1].mxu0  ;;  %v492_v5 = vpop.f32.mrb[1].mxu1  ;;  %v529_v7 = vadd.f32 %v518_v57, %v490_v2 }
 0x189   : > { %v526_v17 = vadd.f32 %v508_v62, %v480_v4  ;;  %v530_v23 = vadd.f32 %v518_v57, %v492_v5  ;;  %v1902_v57 = vpop.permute.xlu1 %934 }
 0x18a   : > { %v1775_v6 = vmax.f32 %v525_v3, 0.0  ;;  %v1787_v15 = vmax.f32 %v529_v7, 0.0  ;;  %v1913_v3 = vpop.permute.xlu0 %818 }
 0x18b   : > { %v484_v9 = vpop.f32.mrb[2].mxu0  ;;  %v496_v12 = vpop.f32.mrb[2].mxu1  ;;  %v1805_v19 = vmax.f32 %v526_v17, 0.0  ;;  %v1811_v0 = vmax.f32 %v530_v23, 0.0  ;;  %2527 = vst [vmem:[#allocation23_spill] sm:$0xff] %v1913_v3 }
 0x18c   : > { %v1777_v13 = vpop.f32.mrb[3].mxu0  ;;  %v1779_v8 = vpop.f32.mrb[3].mxu1  ;;  %677 = vrot.lane.b32.xlu0 %v1775_v6, %s1404_s17  ;;  %545 = vrot.lane.b32.xlu1 %v1775_v6, %s1403_s16  ;;  %v527_v34 = vadd.f32 %v1769_v56, %v484_v9  ;;  %v531_v26 = vadd.f32 %v523_v33, %v496_v12 }
 0x18d   : > { %v528_v62 = vadd.f32 %v1769_v56, %v1777_v13  ;;  %v532_v2 = vadd.f32 %v523_v33, %v1779_v8  ;;  %v1915_v4 = vpop.permute.xlu1 %882 }
 0x18e   : > { %v1830_v25 = vmax.f32 %v527_v34, 0.0  ;;  %v1840_v37 = vmax.f32 %v531_v26, 0.0  ;;  %2528 = vst [vmem:[#allocation24_spill] sm:$0xff] %v1915_v4  ;;  %v1923_v5 = vpop.permute.xlu0 %874 }
 0x18f   : > { %v1910_v63 = vmax.f32 %v528_v62, 0.0  ;;  %v1921_v56 = vmax.f32 %v532_v2, 0.0  ;;  %2530 = vst [vmem:[#allocation26_spill] sm:$0xff] %v1923_v5 }
 0x190   : > { %681 = vrot.lane.b32.xlu0 %v1787_v15, %s1404_s17  ;;  %549 = vrot.lane.b32.xlu1 %v1787_v15, %s1403_s16  ;;  %2516 = vst [vmem:[#allocation13_spill] sm:$0xff] %v1830_v25  ;;  %2519 = vst [vmem:[#allocation15_spill] sm:$0xff] %v1840_v37 }
 0x191   : > { %2526 = vst [vmem:[#allocation22_spill] sm:$0xff] %v1910_v63  ;;  %2529 = vst [vmem:[#allocation25_spill] sm:$0xff] %v1921_v56  ;;  %v1929_v7 = vpop.permute.xlu1 %942 }
 0x192   : > { %2531 = vst [vmem:[#allocation27_spill] sm:$0xff] %v1929_v7  ;;  %v1933_v9 = vpop.permute.xlu0 %938 }
 0x193   : > { %2532 = vst [vmem:[#allocation28_spill] sm:$0xff] %v1933_v9 }
 0x194   : > { %965 = vrot.lane.b32.xlu0 %v1775_v6, %s1409_s21  ;;  %613 = vrot.lane.b32.xlu1 %v1775_v6, %s1402_s15 }
 0x195   : > { %v1937_v12 = vpop.permute.xlu1 %1002 }
 0x196   : > { %2533 = vst [vmem:[#allocation29_spill] sm:$0xff] %v1937_v12  ;;  %v1943_v13 = vpop.permute.xlu0 %1066 }
 0x197   : > { %2534 = vst [vmem:[#allocation30_spill] sm:$0xff] %v1943_v13 }
 0x198   : > { %1033 = vrot.lane.b32.xlu0 %v1787_v15, %s1411_s22  ;;  %617 = vrot.lane.b32.xlu1 %v1787_v15, %s1402_s15 }
 0x199   : > { %v1947_v8 = vpop.permute.xlu1 %946 }
 0x19a   : > { %2535 = vst [vmem:[#allocation31_spill] sm:$0xff] %v1947_v8  ;;  %v1953_v17 = vpop.permute.xlu0 %998 }
 0x19c   : > { %685 = vrot.lane.b32.xlu0 %v1805_v19, %s1404_s17  ;;  %741 = vrot.lane.b32.xlu1 %v1775_v6, %s1405_s18 }
 0x19d   : > { %v1957_v23 = vpop.permute.xlu1 %1062 }
 0x19e   : > { %2536 = vst [vmem:[#allocation32_spill] sm:$0xff] %v1957_v23  ;;  %v1963_v33 = vpop.permute.xlu0 %1006 }
 0x19f   : > { %2537 = vst [vmem:[#allocation33_spill] sm:$0xff] %v1963_v33 }
 0x1a0   : > { %689 = vrot.lane.b32.xlu0 %v1811_v0, %s1404_s17  ;;  %745 = vrot.lane.b32.xlu1 %v1787_v15, %s1405_s18 }
 0x1a1   : > { %v1967_v34 = vpop.permute.xlu1 %1070 }
 0x1a2   : > { %2538 = vst [vmem:[#allocation34_spill] sm:$0xff] %v1967_v34  ;;  %v1973_v26 = vpop.permute.xlu0 %1010 }
 0x1a3   : > { %2539 = vst [vmem:[#allocation35_spill] sm:$0xff] %v1973_v26 }
 0x1a4   : > { %973 = vrot.lane.b32.xlu0 %v1805_v19, %s1409_s21  ;;  %837 = vrot.lane.b32.xlu1 %v1775_v6, %s2515_s30 }
 0x1a5   : > { %v1977_v62 = vpop.permute.xlu1 %1074 }
 0x1a6   : > { %2540 = vst [vmem:[#allocation36_spill] sm:$0xff] %v1977_v62 }
 0x1a8   : > { %977 = vrot.lane.b32.xlu0 %v1811_v0, %s1409_s21  ;;  %841 = vrot.lane.b32.xlu1 %v1787_v15, %s2515_s30 }
 0x1ac   : > { %547 = vrot.lane.b32.xlu0 %v1830_v25, %s1403_s16  ;;  %901 = vrot.lane.b32.xlu1 %v1775_v6, %s2518_s10 }
 0x1b0   : > { %551 = vrot.lane.b32.xlu0 %v1840_v37, %s1403_s16  ;;  %905 = vrot.lane.b32.xlu1 %v1787_v15, %s2518_s10 }
 0x1b4   : > { %615 = vrot.lane.b32.xlu0 %v1830_v25, %s1402_s15  ;;  %969 = vrot.lane.b32.xlu1 %v1787_v15, %s1409_s21 }
 0x1b8   : > { %619 = vrot.lane.b32.xlu0 %v1840_v37, %s1402_s15  ;;  %1029 = vrot.lane.b32.xlu1 %v1775_v6, %s1411_s22 }
 0x1bc   : > { %743 = vrot.lane.b32.xlu0 %v1830_v25, %s1405_s18  ;;  %553 = vrot.lane.b32.xlu1 %v1805_v19, %s1403_s16 }
 0x1c0   : > { %747 = vrot.lane.b32.xlu0 %v1840_v37, %s1405_s18  ;;  %557 = vrot.lane.b32.xlu1 %v1811_v0, %s1403_s16 }
 0x1c4   : > { %839 = vrot.lane.b32.xlu0 %v1830_v25, %s2515_s30  ;;  %621 = vrot.lane.b32.xlu1 %v1805_v19, %s1402_s15 }
 0x1c8   : > { %843 = vrot.lane.b32.xlu0 %v1840_v37, %s2515_s30  ;;  %625 = vrot.lane.b32.xlu1 %v1811_v0, %s1402_s15 }
 0x1cc   : > { %903 = vrot.lane.b32.xlu0 %v1830_v25, %s2518_s10  ;;  %749 = vrot.lane.b32.xlu1 %v1805_v19, %s1405_s18 }
 0x1d0   : > { %1031 = vrot.lane.b32.xlu0 %v1830_v25, %s1411_s22  ;;  %753 = vrot.lane.b32.xlu1 %v1811_v0, %s1405_s18 }
 0x1d4   : > { %971 = vrot.lane.b32.xlu0 %v1840_v37, %s1409_s21  ;;  %845 = vrot.lane.b32.xlu1 %v1805_v19, %s2515_s30 }
 0x1d8   : > { %555 = vrot.lane.b32.xlu0 %v1910_v63, %s1403_s16  ;;  %849 = vrot.lane.b32.xlu1 %v1811_v0, %s2515_s30 }
 0x1dc   : > { %559 = vrot.lane.b32.xlu0 %v1921_v56, %s1403_s16  ;;  %909 = vrot.lane.b32.xlu1 %v1805_v19, %s2518_s10  ;;  %s243_s16 = sand.u32 1, %s1392_s24  }
 0x1dd   : > { %s1139_s20 = scalar_lea.sflag [#allocation4], %s243_s16 }
 0x1e0   : > { %623 = vrot.lane.b32.xlu0 %v1910_v63, %s1402_s15  ;;  %913 = vrot.lane.b32.xlu1 %v1811_v0, %s2518_s10 }
 0x1e4   : > { %627 = vrot.lane.b32.xlu0 %v1921_v56, %s1402_s15  ;;  %1037 = vrot.lane.b32.xlu1 %v1805_v19, %s1411_s22  ;;  %s1111_s15 = sld [smem:[#allocation2]] }
 0x1e8   : > { %751 = vrot.lane.b32.xlu0 %v1910_v63, %s1405_s18  ;;  %1041 = vrot.lane.b32.xlu1 %v1811_v0, %s1411_s22 }
 0x1ec   : > { %755 = vrot.lane.b32.xlu0 %v1921_v56, %s1405_s18  ;;  %679 = vrot.lane.b32.xlu1 %v1830_v25, %s1404_s17  ;;  %s1231_s18 = sshll.u32 %s1481_s5, 5  ;;  %s1421_s5 = smov [#allocation3]  }
 0x1ed   : > { %s2408_s19 = scalar_lea.hbm %s2456_s6, %s1231_s18  ;;  %s1342_s14 = sshll.u32 %s1421_s5, 4  ;;  %s1343_s14 = int_to_ptr.vmem [resolvable:$false] %s1342_s14 }
 0x1ee   : > { %s1344_s27 = scalar_lea.vmem %s1343_s14, 64 }
 0x1f0   : > { %847 = vrot.lane.b32.xlu0 %v1910_v63, %s2515_s30  ;;  %683 = vrot.lane.b32.xlu1 %v1840_v37, %s1404_s17 }
 0x1f4   : > { %851 = vrot.lane.b32.xlu0 %v1921_v56, %s2515_s30  ;;  %967 = vrot.lane.b32.xlu1 %v1830_v25, %s1409_s21 }
 0x1f8   : > { %911 = vrot.lane.b32.xlu0 %v1910_v63, %s2518_s10  ;;  %907 = vrot.lane.b32.xlu1 %v1840_v37, %s2518_s10 }
 0x1fc   : > { %915 = vrot.lane.b32.xlu0 %v1921_v56, %s2518_s10  ;;  %687 = vrot.lane.b32.xlu1 %v1910_v63, %s1404_s17 }
 0x1fe   : > { %v678_v2 = vpop.permute.xlu0 %677  ;;  %v546_v20 = vpop.permute.xlu1 %545 }
 0x200   : > { %1039 = vrot.lane.b32.xlu0 %v1910_v63, %s1411_s22  ;;  %691 = vrot.lane.b32.xlu1 %v1921_v56, %s1404_s17  ;;  %s1216_s17 = sshll.u32 %s243_s16, 1 }
 0x202   : > { %v682_v21 = vpop.permute.xlu0 %681  ;;  %v550_v26 = vpop.permute.xlu1 %549 }
 0x204   : > { %1035 = vrot.lane.b32.xlu0 %v1840_v37, %s1411_s22  ;;  %975 = vrot.lane.b32.xlu1 %v1910_v63, %s1409_s21 }
 0x206   : > { %v966_v62 = vpop.permute.xlu0 %965  ;;  %v614_v13 = vpop.permute.xlu1 %613 }
 0x208   : > { %979 = vrot.lane.b32.xlu1 %v1921_v56, %s1409_s21  ;;  %s245_s21 = scalar_lea.vmem [#allocation3], %s1216_s17 }
 0x20a   : > { %v1993_v12 = vpop.permute.xlu0 %1033  ;;  %v618_v8 = vpop.permute.xlu1 %617 }
 0x20b   : > { %2541 = vst [vmem:[#allocation37_spill] sm:$0xff] %v1993_v12 }
 0x20c   : > { %1043 = vrot.lane.b32.xlu1 %v1921_v56, %s1411_s22  ;;  %s1153_s22 = sshll.u32 %s245_s21, 4  ;;  %s2410_s22 = int_to_ptr.vmem [resolvable:$true] %s1153_s22 }
 0x20d   : > { %s1338_s13 = scalar_lea.vmem %s2410_s22, 32  ;;  %p1345_p0 = scmp.lt.s32.totalorder %s2410_s22, %s1343_s14 }
 0x20e   : > { %v686_v47 = vpop.permute.xlu0 %685  ;;  %v1997_v9 = vpop.permute.xlu1 %741  ;;  %p1339_p11 = scmp.ne.s32.totalorder %s2410_s22, %s1338_s13  ;;  %p1346_p1 = scmp.lt.s32.totalorder %s1344_s27, %s1338_s13 }
 0x20f   : > { %v693_v1 = vsel %vm297_vm2, %v678_v2, %v686_v47  ;;  %v697_v4 = vsel %vm297_vm2, %v686_v47, %v678_v2 }
 0x210   : > { %v701_v38 = vmul.f32 %v697_v4, %v1666_v49  ;;  %p1340_p12 = pnand %p1339_p11, %p1498_p5  ;;  %p1347_p2 = por %p1346_p1, %p1345_p0 }
 0x212   : > { %v690_v5 = vpop.permute.xlu0 %689  ;;  %v2003_v42 = vpop.permute.xlu1 %745  ;;  %p1341_p13 = pneg %p1340_p12 }
 0x213   : > { %v695_v50 = vsel %vm297_vm2, %v682_v21, %v690_v5  ;;  %v699_v34 = vsel %vm297_vm2, %v690_v5, %v682_v21 }
 0x214   : > { %p1348_p3 = pnand %p1347_p2, %p1341_p13 }
 0x216   : > { %v974_v40 = vpop.permute.xlu0 %973  ;;  %v2009_v18 = vpop.permute.xlu1 %837 }
 0x217   : > { %v2013_v36 = vsel %vm365_vm6, %v966_v62, %v974_v40  ;;  %v2017_v43 = vsel %vm365_vm6, %v974_v40, %v966_v62 }
 0x21a   : > { %v978_v47 = vpop.permute.xlu0 %977  ;;  %v2019_v2 = vpop.permute.xlu1 %841 }
 0x21e   : > { %v2021_v12 = vpop.permute.xlu0 %547  ;;  %v2023_v63 = vpop.permute.xlu1 %901 }
 0x21f   : > { %2542 = vst [vmem:[#allocation38_spill] sm:$0xff] %v2021_v12 }
 0x222   : > { %v2025_v44 = vpop.permute.xlu0 %551  ;;  %v2027_v21 = vpop.permute.xlu1 %905 }
 0x223   : > { %2543 = vst [vmem:[#allocation39_spill] sm:$0xff] %v2025_v44 }
 0x226   : > { %v2029_v5 = vpop.permute.xlu0 %615  ;;  %v970_v25 = vpop.permute.xlu1 %969 }
 0x227   : > { %2544 = vst [vmem:[#allocation40_spill] sm:$0xff] %v2029_v5  ;;  %v2033_v56 = vsel %vm365_vm6, %v970_v25, %v978_v47  ;;  %v2037_v40 = vsel %vm365_vm6, %v978_v47, %v970_v25  ;;  %v702_v25 = vmul.f32 %v693_v1, %v1670_v51 }
 0x228   : > { %2545 = vst [vmem:[#allocation41_spill] sm:$0xff] %v2037_v40 }
 0x22a   : > { %v2039_v62 = vpop.permute.xlu0 %619  ;;  %v2041_v3 = vpop.permute.xlu1 %1029 }
 0x22b   : > { %2546 = vst [vmem:[#allocation42_spill] sm:$0xff] %v2039_v62  ;;  %2547 = vst [vmem:[#allocation43_spill] sm:$0xff] %v2041_v3 }
 0x22e   : > { %v2043_v37 = vpop.permute.xlu0 %743  ;;  %v554_v44 = vpop.permute.xlu1 %553 }
 0x22f   : > { %2548 = vst [vmem:[#allocation44_spill] sm:$0xff] %v2043_v37  ;;  %v561_v5 = vsel %vm263_vm1, %v546_v20, %v554_v44  ;;  %v565_v33 = vsel %vm263_vm1, %v554_v44, %v546_v20 }
 0x230   : > { %v569_v62 = vmul.f32 %v565_v33, %v1643_v31  ;;  %v570_v37 = vmul.f32 %v561_v5, %v1637_v29  ;;  %v725_v33 = vmul.f32 %v1868_v45, %v701_v38  ;;  %v726_v5 = vmul.f32 %v1868_v45, %v702_v25 }
 0x231   : > { %v706_v38 = vmul.f32 %v695_v50, %v1670_v51 }
 0x232   : > { %v2045_v12 = vpop.permute.xlu0 %747  ;;  %v558_v23 = vpop.permute.xlu1 %557  ;;  %v598_v40 = vmul.f32 %v1771_v58, %v570_v37 }
 0x233   : > { %2549 = vst [vmem:[#allocation45_spill] sm:$0xff] %v2045_v12  ;;  %v563_v12 = vsel %vm263_vm1, %v550_v26, %v558_v23  ;;  %v567_v41 = vsel %vm263_vm1, %v558_v23, %v550_v26  ;;  %v597_v26 = vmul.f32 %v1771_v58, %v569_v62 }
 0x234   : > { %v574_v7 = vmul.f32 %v563_v12, %v1637_v29 }
 0x236   : > { %v2053_v47 = vpop.permute.xlu0 %839  ;;  %v622_v3 = vpop.permute.xlu1 %621 }
 0x237   : > { %2550 = vst [vmem:[#allocation46_spill] sm:$0xff] %v2053_v47  ;;  %v629_v20 = vsel %vm280_vm0, %v614_v13, %v622_v3  ;;  %v633_v44 = vsel %vm280_vm0, %v622_v3, %v614_v13  ;;  %v573_v47 = vmul.f32 %v567_v41, %v1643_v31 }
 0x238   : > { %v637_v1 = vmul.f32 %v633_v44, %v1646_v32  ;;  %v638_v4 = vmul.f32 %v629_v20, %v1640_v30  ;;  %v705_v20 = vmul.f32 %v699_v34, %v1666_v49 }
 0x239   : > { %v601_v37 = vmul.f32 %v1773_v59, %v573_v47 }
 0x23a   : > { %v2071_v23 = vpop.permute.xlu0 %843  ;;  %v661_v3 = vmul.f32 %v1783_v14, %v637_v1  ;;  %v662_v13 = vmul.f32 %v1783_v14, %v638_v4  ;;  %v626_v44 = vpop.permute.xlu1 %625  ;;  %v602_v14 = vmul.f32 %v1773_v59, %v574_v7 }
 0x23b   : > { %v631_v41 = vsel %vm280_vm0, %v618_v8, %v626_v44  ;;  %v635_v45 = vsel %vm280_vm0, %v626_v44, %v618_v8  ;;  %v729_v8 = vmul.f32 %v1821_v11, %v705_v20 }
 0x23c   : > { %v669_v12 = vadd.f32 %v661_v3, %v597_v26  ;;  %v670_v25 = vadd.f32 %v662_v13, %v598_v40  ;;  %v641_v62 = vmul.f32 %v635_v45, %v1646_v32  ;;  %v642_v58 = vmul.f32 %v631_v41, %v1640_v30 }
 0x23d   : > { %v730_v40 = vmul.f32 %v1821_v11, %v706_v38  ;;  %v821_v38 = vmul.f32 %v1896_v55, %v1775_v6 }
 0x23e   : > { %v2087_v1 = vpop.permute.xlu0 %903  ;;  %v665_v50 = vmul.f32 %v1793_v16, %v641_v62  ;;  %v666_v34 = vmul.f32 %v1793_v16, %v642_v58  ;;  %v750_v4 = vpop.permute.xlu1 %749  ;;  %v733_v51 = vadd.f32 %v725_v33, %v669_v12  ;;  %v734_v49 = vadd.f32 %v726_v5, %v670_v25 }
 0x23f   : > { %v757_v26 = vsel %vm314_vm3, %v1997_v9, %v750_v4  ;;  %v761_v59 = vsel %vm314_vm3, %v750_v4, %v1997_v9 }
 0x240   : > { %v673_v7 = vadd.f32 %v665_v50, %v601_v37  ;;  %v674_v47 = vadd.f32 %v666_v34, %v602_v14  ;;  %v765_v3 = vmul.f32 %v761_v59, %v1674_v52  ;;  %v766_v16 = vmul.f32 %v757_v26, %v1677_v53 }
 0x241   : > { %v825_v50 = vmul.f32 %v1874_v46, %v1787_v15 }
 0x242   : > { %v2101_v33 = vpop.permute.xlu0 %1031  ;;  %v789_v5 = vmul.f32 %v1832_v35, %v765_v3  ;;  %v790_v11 = vmul.f32 %v1832_v35, %v766_v16  ;;  %v754_v13 = vpop.permute.xlu1 %753  ;;  %v737_v44 = vadd.f32 %v729_v8, %v673_v7  ;;  %v738_v20 = vadd.f32 %v730_v40, %v674_v47 }
 0x243   : > { %v759_v9 = vsel %vm314_vm3, %v2003_v42, %v754_v13  ;;  %v763_v41 = vsel %vm314_vm3, %v754_v13, %v2003_v42  ;;  %v822_v42 = vmul.f32 %v1896_v55, %v1805_v19  ;;  %v826_v7 = vmul.f32 %v1874_v46, %v1811_v0 }
 0x244   : > { %v797_v45 = vadd.f32 %v789_v5, %v733_v51  ;;  %v798_v12 = vadd.f32 %v790_v11, %v734_v49  ;;  %v769_v25 = vmul.f32 %v763_v41, %v1674_v52  ;;  %v770_v35 = vmul.f32 %v759_v9, %v1677_v53 }
 0x246   : > { %v2115_v62 = vpop.permute.xlu0 %971  ;;  %v793_v58 = vmul.f32 %v1844_v39, %v769_v25  ;;  %v794_v6 = vmul.f32 %v1844_v39, %v770_v35  ;;  %v846_v37 = vpop.permute.xlu1 %845  ;;  %v829_v14 = vadd.f32 %v821_v38, %v797_v45  ;;  %v830_v15 = vadd.f32 %v822_v42, %v798_v12 }
 0x247   : > { %v853_v49 = vsel %vm331_vm4, %v2009_v18, %v846_v37  ;;  %v857_v51 = vsel %vm331_vm4, %v846_v37, %v2009_v18  ;;  %v990_v38 = vmul.f32 %v2017_v43, %v1724_v28 }
 0x248   : > { %v801_v34 = vadd.f32 %v793_v58, %v737_v44  ;;  %v802_v4 = vadd.f32 %v794_v6, %v738_v20  ;;  %v861_v39 = vmul.f32 %v853_v49, %v1690_v60  ;;  %v862_v8 = vmul.f32 %v857_v51, %v1693_v61  ;;  %v2551_v51 = vld [vmem:[#allocation41_spill] sm:$0xff] }
 0x249   : > { %v989_v20 = vmul.f32 %v2013_v36, %v1721_v27  ;;  %v1014_v6 = vmul.f32 %v1953_v17, %v990_v38 }
 0x24a   : > { %v2131_v40 = vpop.permute.xlu0 %555  ;;  %v885_v26 = vmul.f32 %v1882_v48, %v861_v39  ;;  %v886_v19 = vmul.f32 %v1882_v48, %v862_v8  ;;  %v850_v55 = vpop.permute.xlu1 %849  ;;  %v833_v59 = vadd.f32 %v825_v50, %v801_v34  ;;  %v834_v13 = vadd.f32 %v826_v7, %v802_v4  ;;  %v2552_v4 = vld [vmem:[#allocation27_spill] sm:$0xff] }
 0x24b   : > { %v855_v18 = vsel %vm331_vm4, %v2019_v2, %v850_v55  ;;  %v859_v47 = vsel %vm331_vm4, %v850_v55, %v2019_v2  ;;  %v1013_v58 = vmul.f32 %v1953_v17, %v989_v20  ;;  %v994_v17 = vmul.f32 %v2551_v51, %v1724_v28 }
 0x24c   : > { %v893_v3 = vadd.f32 %v885_v26, %v829_v14  ;;  %v894_v16 = vadd.f32 %v886_v19, %v830_v15  ;;  %v865_v5 = vmul.f32 %v855_v18, %v1690_v60  ;;  %v866_v11 = vmul.f32 %v859_v47, %v1693_v61  ;;  %v2553_v19 = vld [vmem:[#allocation43_spill] sm:$0xff]  ;;  %v2554_v18 = vld [vmem:[#allocation10_spill] sm:$0xff] }
 0x24e   : > { %v560_v48 = vpop.permute.xlu0 %559  ;;  %v889_v44 = vmul.f32 %v1894_v54, %v865_v5  ;;  %v890_v0 = vmul.f32 %v1894_v54, %v866_v11  ;;  %v910_v46 = vpop.permute.xlu1 %909  ;;  %v2556_v5 = vld [vmem:[#allocation33_spill] sm:$0xff] }
 0x24f   : > { %v917_v2 = vsel %vm348_vm5, %v2023_v63, %v910_v46  ;;  %v921_v9 = vsel %vm348_vm5, %v910_v46, %v2023_v63 }
 0x250   : > { %v897_v41 = vadd.f32 %v889_v44, %v833_v59  ;;  %v898_v45 = vadd.f32 %v890_v0, %v834_v13  ;;  %v925_v12 = vmul.f32 %v917_v2, %v1713_v10  ;;  %v926_v54 = vmul.f32 %v921_v9, %v1717_v24  ;;  %v2557_v0 = vld [vmem:[#allocation32_spill] sm:$0xff] }
 0x251   : > { %v1018_v13 = vmul.f32 %v2556_v5, %v994_v17 }
 0x252   : > { %v624_v25 = vpop.permute.xlu0 %623  ;;  %v949_v36 = vmul.f32 %v1902_v57, %v925_v12  ;;  %v950_v35 = vmul.f32 %v1902_v57, %v926_v54  ;;  %v914_v43 = vpop.permute.xlu1 %913  ;;  %v993_v57 = vmul.f32 %v2033_v56, %v1721_v27 }
 0x253   : > { %v919_v63 = vsel %vm348_vm5, %v2027_v21, %v914_v43  ;;  %v923_v37 = vsel %vm348_vm5, %v914_v43, %v2027_v21 }
 0x254   : > { %v957_v14 = vadd.f32 %v949_v36, %v893_v3  ;;  %v958_v50 = vadd.f32 %v950_v35, %v894_v16  ;;  %v929_v42 = vmul.f32 %v919_v63, %v1713_v10  ;;  %v930_v49 = vmul.f32 %v923_v37, %v1717_v24  ;;  %v2555_v3 = vld [vmem:[#allocation9_spill] sm:$0xff]  ;;  %v2558_v36 = vld [vmem:[#allocation40_spill] sm:$0xff]  ;;  %v2560_v37 = vld [vmem:[#allocation42_spill] sm:$0xff] }
 0x255   : > { %v1017_v11 = vmul.f32 %v2556_v5, %v993_v57  ;;  %v630_v35 = vsel %vm280_vm0, %v2558_v36, %v624_v25  ;;  %v634_v43 = vsel %vm280_vm0, %v624_v25, %v2558_v36  ;;  %v2561_v25 = vld [vmem:[#allocation39_spill] sm:$0xff]  ;;  %v2570_v36 = vld [vmem:[#allocation44_spill] sm:$0xff] }
 0x256   : > { %v628_v34 = vpop.permute.xlu0 %627  ;;  %v953_v39 = vmul.f32 %v2552_v4, %v929_v42  ;;  %v954_v8 = vmul.f32 %v2552_v4, %v930_v49  ;;  %v1038_v15 = vpop.permute.xlu1 %1037  ;;  %v1021_v26 = vadd.f32 %v1013_v58, %v957_v14  ;;  %v1022_v21 = vadd.f32 %v1014_v6, %v958_v50  ;;  %v2559_v58 = vld [vmem:[#allocation38_spill] sm:$0xff] }
 0x257   : > { %v1045_v55 = vsel %vm382_vm7, %v2553_v19, %v1038_v15  ;;  %v1049_v59 = vsel %vm382_vm7, %v1038_v15, %v2553_v19  ;;  %v562_v6 = vsel %vm263_vm1, %v2559_v58, %v2131_v40  ;;  %v566_v63 = vsel %vm263_vm1, %v2131_v40, %v2559_v58  ;;  %v2562_v15 = vld [vmem:[#allocation15_spill] sm:$0xff]  ;;  %v2564_v19 = vld [vmem:[#allocation25_spill] sm:$0xff] }
 0x258   : > { %v961_v56 = vadd.f32 %v953_v39, %v897_v41  ;;  %v962_v7 = vadd.f32 %v954_v8, %v898_v45  ;;  %v1053_v47 = vmul.f32 %v2554_v18, %v1045_v55  ;;  %v1054_v16 = vmul.f32 %v2555_v3, %v1049_v59  ;;  %v2565_v55 = vld [vmem:[#allocation13_spill] sm:$0xff]  ;;  %v2566_v59 = vld [vmem:[#allocation19_spill] sm:$0xff] }
 0x259   : > { %v632_v14 = vsel %vm280_vm0, %v2560_v37, %v628_v34  ;;  %v636_v50 = vsel %vm280_vm0, %v628_v34, %v2560_v37  ;;  %v564_v49 = vsel %vm263_vm1, %v2561_v25, %v560_v48  ;;  %v568_v57 = vsel %vm263_vm1, %v560_v48, %v2561_v25  ;;  %v2573_v25 = vld [vmem:[#allocation45_spill] sm:$0xff] }
 0x25a   : > { %v752_v44 = vpop.permute.xlu0 %751  ;;  %v1077_v46 = vmul.f32 %v2557_v0, %v1053_v47  ;;  %v1078_v20 = vmul.f32 %v2557_v0, %v1054_v16  ;;  %v1042_v38 = vpop.permute.xlu1 %1041  ;;  %v2189_v2 = vadd.f32 %v1017_v11, %v961_v56  ;;  %v2191_v9 = vadd.f32 %v1018_v13, %v962_v7  ;;  %v2567_v7 = vld [vmem:[#allocation22_spill] sm:$0xff]  ;;  %v2568_v16 = vld [vmem:[#allocation37_spill] sm:$0xff] }
 0x25b   : > { %v639_v51 = vmul.f32 %v634_v43, %v1646_v32  ;;  %v640_v40 = vmul.f32 %v630_v35, %v1640_v30  ;;  %v571_v4 = vmul.f32 %v566_v63, %v1643_v31  ;;  %v572_v39 = vmul.f32 %v562_v6, %v1637_v29  ;;  %v2569_v0 = vld [vmem:[#allocation18_spill] sm:$0xff] }
 0x25c   : > { %v2193_v41 = vadd.f32 %v1077_v46, %v1021_v26  ;;  %v2195_v45 = vadd.f32 %v1078_v20, %v1022_v21  ;;  %v643_v34 = vmul.f32 %v636_v50, %v1646_v32  ;;  %v644_v8 = vmul.f32 %v632_v14, %v1640_v30  ;;  %v2563_v26 = vld [vmem:[#allocation23_spill] sm:$0xff]  ;;  %v2571_v43 = vld [vmem:[#allocation14_spill] sm:$0xff] }
 0x25d   : > { %v2235_v21 = vmul.f32 %v2563_v26, %v2562_v15  ;;  %v2239_v48 = vmul.f32 %v2563_v26, %v2564_v19  ;;  %v2243_v56 = vmul.f32 %v2566_v59, %v2565_v55  ;;  %v2247_v47 = vmul.f32 %v2566_v59, %v2567_v7  ;;  %v2575_v26 = vld [vmem:[#allocation46_spill] sm:$0xff] }
 0x25e   : > { %v756_v12 = vpop.permute.xlu0 %755  ;;  %v2197_v54 = vpop.permute.xlu1 %679  ;;  %v575_v32 = vmul.f32 %v568_v57, %v1643_v31  ;;  %v576_v30 = vmul.f32 %v564_v49, %v1637_v29  ;;  %v1047_v5 = vsel %vm382_vm7, %v2568_v16, %v1042_v38  ;;  %v1051_v11 = vsel %vm382_vm7, %v1042_v38, %v2568_v16  ;;  %v2572_v38 = vld [vmem:[#allocation11_spill] sm:$0xff]  ;;  %v2574_v57 = vld [vmem:[#allocation16_spill] sm:$0xff] }
 0x25f   : > { %v663_v46 = vmul.f32 %v2569_v0, %v639_v51  ;;  %v664_v20 = vmul.f32 %v2569_v0, %v640_v40  ;;  %v758_v35 = vsel %vm314_vm3, %v2570_v36, %v752_v44  ;;  %v762_v29 = vsel %vm314_vm3, %v752_v44, %v2570_v36 }
 0x260   : > { %v599_v58 = vmul.f32 %v2571_v43, %v571_v4  ;;  %v600_v6 = vmul.f32 %v2571_v43, %v572_v39  ;;  %v667_v63 = vmul.f32 %v2572_v38, %v643_v34  ;;  %v668_v37 = vmul.f32 %v2572_v38, %v644_v8 }
 0x261   : > { %v1057_v14 = vmul.f32 %v2554_v18, %v1047_v5  ;;  %v1058_v50 = vmul.f32 %v2555_v3, %v1051_v11  ;;  %v760_v49 = vsel %vm314_vm3, %v2573_v25, %v756_v12  ;;  %v764_v44 = vsel %vm314_vm3, %v756_v12, %v2573_v25  ;;  %v2576_v11 = vld [vmem:[#allocation34_spill] sm:$0xff] }
 0x262   : > { %v848_v42 = vpop.permute.xlu0 %847  ;;  %v2227_v17 = vpop.permute.xlu1 %683  ;;  %v603_v51 = vmul.f32 %v2574_v57, %v575_v32  ;;  %v604_v40 = vmul.f32 %v2574_v57, %v576_v30  ;;  %v767_v4 = vmul.f32 %v762_v29, %v1674_v52  ;;  %v768_v39 = vmul.f32 %v758_v35, %v1677_v53 }
 0x263   : > { %v671_v8 = vadd.f32 %v663_v46, %v599_v58  ;;  %v672_v15 = vadd.f32 %v664_v20, %v600_v6  ;;  %v854_v19 = vsel %vm331_vm4, %v2575_v26, %v848_v42  ;;  %v858_v55 = vsel %vm331_vm4, %v848_v42, %v2575_v26  ;;  %v2577_v46 = vld [vmem:[#allocation21_spill] sm:$0xff]  ;;  %v2583_v26 = vld [vmem:[#allocation12_spill] sm:$0xff] }
 0x264   : > { %v771_v59 = vmul.f32 %v764_v44, %v1674_v52  ;;  %v772_v7 = vmul.f32 %v760_v49, %v1677_v53  ;;  %v675_v16 = vadd.f32 %v667_v63, %v603_v51  ;;  %v676_v5 = vadd.f32 %v668_v37, %v604_v40  ;;  %v2578_v6 = vld [vmem:[#allocation17_spill] sm:$0xff]  ;;  %v2581_v44 = vld [vmem:[#allocation26_spill] sm:$0xff] }
 0x265   : > { %v2298_v0 = vmul.f32 %v2576_v11, %v1057_v14  ;;  %v2301_v42 = vmul.f32 %v2576_v11, %v1058_v50  ;;  %v791_v52 = vmul.f32 %v2577_v46, %v767_v4  ;;  %v792_v53 = vmul.f32 %v2577_v46, %v768_v39  ;;  %v2580_v50 = vld [vmem:[#allocation8_spill] sm:$0xff] }
 0x266   : > { %v852_v13 = vpop.permute.xlu0 %851  ;;  %v2265_v31 = vpop.permute.xlu1 %967  ;;  %v863_v20 = vmul.f32 %v854_v19, %v1690_v60  ;;  %v864_v36 = vmul.f32 %v858_v55, %v1693_v61  ;;  %v795_v38 = vmul.f32 %v2578_v6, %v771_v59  ;;  %v796_v63 = vmul.f32 %v2578_v6, %v772_v7  ;;  %v2582_v39 = vld [vmem:[#allocation24_spill] sm:$0xff] }
 0x267   : > { %v856_v32 = vsel %vm331_vm4, %v2071_v23, %v852_v13  ;;  %v860_v30 = vsel %vm331_vm4, %v852_v13, %v2071_v23 }
 0x268   : > { %v867_v29 = vmul.f32 %v856_v32, %v1690_v60  ;;  %v868_v23 = vmul.f32 %v860_v30, %v1693_v61  ;;  %v2579_v61 = vld [vmem:[#allocation7_spill] sm:$0xff]  ;;  %v887_v57 = vmul.f32 %v2581_v44, %v863_v20  ;;  %v888_v51 = vmul.f32 %v2581_v44, %v864_v36 }
 0x26a   : > { %v912_v34 = vpop.permute.xlu0 %911  ;;  %v908_v12 = vpop.permute.xlu1 %907 }
 0x26b   : > { %v918_v13 = vsel %vm348_vm5, %v2087_v1, %v912_v34  ;;  %v922_v43 = vsel %vm348_vm5, %v912_v34, %v2087_v1  ;;  %v892_v34 = vmul.f32 %v2582_v39, %v868_v23 }
 0x26c   : > { %v927_v40 = vmul.f32 %v918_v13, %v1713_v10  ;;  %v928_v4 = vmul.f32 %v922_v43, %v1717_v24 }
 0x26e   : > { %v916_v35 = vpop.permute.xlu0 %915  ;;  %v688_v58 = vpop.permute.xlu1 %687 }
 0x26f   : > { %v694_v37 = vsel %vm297_vm2, %v2197_v54, %v688_v58  ;;  %v698_v60 = vsel %vm297_vm2, %v688_v58, %v2197_v54  ;;  %v920_v1 = vsel %vm348_vm5, %v908_v12, %v916_v35  ;;  %v924_v49 = vsel %vm348_vm5, %v916_v35, %v908_v12 }
 0x270   : > { %v703_v14 = vmul.f32 %v698_v60, %v2579_v61  ;;  %v704_v25 = vmul.f32 %v694_v37, %v2580_v50  ;;  %v891_v54 = vmul.f32 %v2582_v39, %v867_v29  ;;  %v931_v12 = vmul.f32 %v920_v1, %v1713_v10  ;;  %v2584_v29 = vld [vmem:[#allocation28_spill] sm:$0xff]  ;;  %v2586_v37 = vld [vmem:[#allocation31_spill] sm:$0xff] }
 0x271   : > { %v932_v32 = vmul.f32 %v924_v49, %v1717_v24  ;;  %v951_v23 = vmul.f32 %v2584_v29, %v927_v40  ;;  %v952_v10 = vmul.f32 %v2584_v29, %v928_v4  ;;  %v2589_v29 = vld [vmem:[#allocation35_spill] sm:$0xff] }
 0x272   : > { %v727_v19 = vmul.f32 %v2583_v26, %v703_v14  ;;  %v728_v55 = vmul.f32 %v2583_v26, %v704_v25  ;;  %v692_v59 = vpop.permute.xlu1 %691  ;;  %v1040_v7 = vpop.permute.xlu0 %1039  ;;  %v955_v60 = vmul.f32 %v2586_v37, %v931_v12 }
 0x273   : > { %v696_v30 = vsel %vm297_vm2, %v2227_v17, %v692_v59  ;;  %v700_v11 = vsel %vm297_vm2, %v692_v59, %v2227_v17  ;;  %v1046_v24 = vsel %vm382_vm7, %v2101_v33, %v1040_v7  ;;  %v1050_v13 = vsel %vm382_vm7, %v1040_v7, %v2101_v33 }
 0x274   : > { %v735_v46 = vadd.f32 %v727_v19, %v671_v8  ;;  %v736_v20 = vadd.f32 %v728_v55, %v672_v15  ;;  %v707_v36 = vmul.f32 %v700_v11, %v2579_v61  ;;  %v708_v35 = vmul.f32 %v696_v30, %v2580_v50  ;;  %v2585_v8 = vld [vmem:[#allocation20_spill] sm:$0xff] }
 0x275   : > { %v956_v61 = vmul.f32 %v2586_v37, %v932_v32  ;;  %v1055_v1 = vmul.f32 %v2554_v18, %v1046_v24  ;;  %v1056_v49 = vmul.f32 %v2555_v3, %v1050_v13 }
 0x276   : > { %v799_v43 = vadd.f32 %v791_v52, %v735_v46  ;;  %v800_v17 = vadd.f32 %v792_v53, %v736_v20  ;;  %v731_v15 = vmul.f32 %v2585_v8, %v707_v36  ;;  %v732_v58 = vmul.f32 %v2585_v8, %v708_v35  ;;  %v976_v6 = vpop.permute.xlu1 %975  ;;  %v1036_v20 = vpop.permute.xlu0 %1035 }
 0x277   : > { %v982_v14 = vsel %vm365_vm6, %v2265_v31, %v976_v6  ;;  %v986_v50 = vsel %vm365_vm6, %v976_v6, %v2265_v31  ;;  %v2587_v31 = vld [vmem:[#allocation29_spill] sm:$0xff]  ;;  %v2590_v6 = vld [vmem:[#allocation36_spill] sm:$0xff] }
 0x278   : > { %v831_v33 = vadd.f32 %v2243_v56, %v799_v43  ;;  %v832_v52 = vadd.f32 %v2247_v47, %v800_v17  ;;  %v739_v53 = vadd.f32 %v731_v15, %v675_v16  ;;  %v740_v25 = vadd.f32 %v732_v58, %v676_v5 }
 0x279   : > { %v991_v44 = vmul.f32 %v982_v14, %v1721_v27  ;;  %v992_v40 = vmul.f32 %v986_v50, %v1724_v28  ;;  %v1089_v43 = vadd.f32 %v2298_v0, %v2189_v2 }
 0x27a   : > { %v803_v4 = vadd.f32 %v795_v38, %v739_v53  ;;  %v804_v39 = vadd.f32 %v796_v63, %v740_v25  ;;  %v895_v26 = vadd.f32 %v887_v57, %v831_v33  ;;  %v896_v19 = vadd.f32 %v888_v51, %v832_v52  ;;  %v980_v55 = vpop.permute.xlu1 %979  ;;  %v2588_v51 = vld [vmem:[#allocation30_spill] sm:$0xff] }
 0x27b   : > { %v1015_v59 = vmul.f32 %v2587_v31, %v991_v44  ;;  %v1016_v56 = vmul.f32 %v2587_v31, %v992_v40  ;;  %v984_v47 = vsel %vm365_vm6, %v2115_v62, %v980_v55  ;;  %v988_v16 = vsel %vm365_vm6, %v980_v55, %v2115_v62  ;;  %v2591_v31 = vld [vmem:[#allocation6_spill] sm:$0xff] }
 0x27c   : > { %v835_v5 = vadd.f32 %v2235_v21, %v803_v4  ;;  %v836_v38 = vadd.f32 %v2239_v48, %v804_v39  ;;  %v959_v63 = vadd.f32 %v951_v23, %v895_v26  ;;  %v960_v57 = vadd.f32 %v952_v10, %v896_v19 }
 0x27d   : > { %v1079_v7 = vmul.f32 %v2588_v51, %v1055_v1  ;;  %v1080_v12 = vmul.f32 %v2588_v51, %v1056_v49  ;;  %v995_v32 = vmul.f32 %v984_v47, %v1721_v27  ;;  %v996_v30 = vmul.f32 %v988_v16, %v1724_v28 }
 0x27e   : > { %v1023_v11 = vadd.f32 %v1015_v59, %v959_v63  ;;  %v1024_v46 = vadd.f32 %v1016_v56, %v960_v57  ;;  %v899_v36 = vadd.f32 %v891_v54, %v835_v5  ;;  %v900_v35 = vadd.f32 %v892_v34, %v836_v38  ;;  %v1044_v62 = vpop.permute.xlu1 %1043 }
 0x27f   : > { %v1019_v21 = vmul.f32 %v2589_v29, %v995_v32  ;;  %v1020_v48 = vmul.f32 %v2589_v29, %v996_v30  ;;  %v1048_v23 = vsel %vm382_vm7, %v1036_v20, %v1044_v62  ;;  %v1052_v10 = vsel %vm382_vm7, %v1044_v62, %v1036_v20 }
 0x280   : > { %v1087_v24 = vadd.f32 %v1079_v7, %v1023_v11  ;;  %v1088_v27 = vadd.f32 %v1080_v12, %v1024_v46  ;;  %v963_v13 = vadd.f32 %v955_v60, %v899_v36  ;;  %v964_v28 = vadd.f32 %v956_v61, %v900_v35 }
 0x281   : > { %v1090_v54 = vadd.f32 %v2301_v42, %v2191_v9  ;;  %v1059_v34 = vmul.f32 %v2554_v18, %v1048_v23  ;;  %v1060_v17 = vmul.f32 %v2555_v3, %v1052_v10  ;;  %v1420_v52 = vmov 1966171168  }
 0x282   : > { %v1093_v8 = vadd.f32 %v1087_v24, %v2193_v41  ;;  %v1102_v15 = vadd.f32 %v1088_v27, %v2195_v45  ;;  %v1027_v22 = vadd.f32 %v1019_v21, %v963_v13  ;;  %v1028_v58 = vadd.f32 %v1020_v48, %v964_v28 }
 0x283   : > { %v1083_v37 = vmul.f32 %v2590_v6, %v1059_v34  ;;  %v1084_v60 = vmul.f32 %v2590_v6, %v1060_v17  ;;  %v1119_v53 = vunpack.c.l.s4 %v1420_v52  ;;  %v1112_v4 = vstv %s1111_s15 }
 0x284   : > { %v1094_v61 = vadd.f32 %v1093_v8, %v1089_v43  ;;  %v1103_v14 = vadd.f32 %v1102_v15, %v1090_v54  ;;  %v2592_v16 = vlaneseq }
 0x285   : > { %v1091_v2 = vadd.f32 %v1083_v37, %v1027_v22  ;;  %v1092_v0 = vadd.f32 %v1084_v60, %v1028_v58  ;;  %v1120_v40 = vunpack.c.0.s8 %v1119_v53 }
 0x286   : > { %vm1135_vm9 = vcmp.lt.s32.totalorder %v2592_v16, 256 }
 0x287   : > { %v1095_v9 = vadd.f32 %v1094_v61, %v1091_v2  ;;  %v1104_v42 = vadd.f32 %v1103_v14, %v1092_v0  ;;  %v1123_v59 = vsub.s32 %v1120_v40, %v2591_v31 }
 0x289   : > { %v1096_v18 = vrot.slane %v1095_v9, 4  ;;  %v1105_v50 = vrot.slane %v1104_v42, 4 }
 0x28b   : > { %v1097_v3 = vadd.f32 %v1096_v18, %v1095_v9  ;;  %v1106_v41 = vadd.f32 %v1105_v50, %v1104_v42 }
 0x28d   : > { %v1098_v33 = vrot.slane %v1097_v3, 2  ;;  %v1107_v45 = vrot.slane %v1106_v41, 2 }
 0x28f   : > { %v1099_v25 = vadd.f32 %v1098_v33, %v1097_v3  ;;  %v1108_v1 = vadd.f32 %v1107_v45, %v1106_v41 }
 0x291   : > { %v1100_v49 = vrot.slane %v1099_v25, 1  ;;  %v1109_v44 = vrot.slane %v1108_v1, 1 }
 0x293   : > { %v1101_v39 = vadd.f32 %v1100_v49, %v1099_v25  ;;  %v1110_v26 = vadd.f32 %v1109_v44, %v1108_v1 }
 0x295   : > { %v1113_v19 = vadd.f32 %v1112_v4, %v1101_v39  ;;  %v1114_v55 = vadd.f32 %v1112_v4, %v1110_v26 }
 0x297   : > { %v1117_v56 = vcombine.low %v1113_v19, %v1114_v55 }
 0x299   : > { %v1124_v47 = vrot.slane %v1117_v56, %v1123_v59 }
 0x29b   : > { %v1131_v5 = vrot.slane %v1124_v47, %v1123_v59 }
 0x29d   : > { %1137 = vst.msk [vmem:[%s245_s21] sm:$0x3] %vm1135_vm9, %v1131_v5 }
 0x29e   : > { %1351 = shalt.err (!%p1348_p3)
}
 0x29f   : > { %s1352_s29 = scalar_lea.hbm %s2408_s19, 32  ;;  %s1356_s15 = scalar_lea.hbm %s2456_s6, 64 }
 0x2a0   : > { %p1353_p4 = scmp.ne.s32.totalorder %s2408_s19, %s1352_s29  ;;  %p1357_p9 = scmp.lt.u32.totalorder %s2408_s19, %s2456_s6 }
 0x2a1   : > { %p1358_p10 = scmp.lt.u32.totalorder %s1356_s15, %s1352_s29  ;;  %p1360_p12 = scmp.lt.u32.totalorder %s1352_s29, %s2408_s19 }
 0x2a2   : > { %p1354_p7 = pnand %p1353_p4, %p1498_p5 }
 0x2a3   : > { %p1359_p11 = por %p1358_p10, %p1357_p9 }
 0x2a4   : > { %p1355_p8 = pneg %p1354_p7 }
 0x2a5   : > { %p1361_p13 = por %p1360_p12, %p1359_p11 }
 0x2a7   : > { %p1362_p0 = pnand %p1361_p13, %p1355_p8 }
 0x2a9   : > { %1365 = shalt.err (!%p1362_p0)
}
 0x2aa   : > { %1258 = dma.vmem_to_hbm [thread:$0]  (%p1498_p5), %s2410_s22, 32, %s2408_s19, %s1139_s20  }
 0x2ab PF: > { %p1264_p1 = scmp.ge.s32.totalorder %s1400_s26, 2  ;;  %s1165_s18 = sand.u32 1, %s1388_s23  }
 0x2ac   : > { %s1166_s21 = scalar_lea.sflag [#allocation4], %s1165_s18 }
 0x2ad   : > { %p1261_p2 = pnand %p1264_p1, %p1502_p6 }
 0x2af   : > { %1383 = dma.done.wait (!%p1261_p2), %s1166_s21, 32  }
 0x2b0   : > { %1385 = vsyncadd (!%p1261_p2), %s1166_s21, 4294967264  ;;  %p17_p3 = scmp.ge.s32.totalorder %s1485_s28, 4   ;;  %s2593_s23 = smov %s1392_s24 }
 0x2b1   : > { %s2594_s24 = smov %s1396_s25  ;;  %s2595_s25 = smov %s1496_s7 }
 0x2b2   : > { %s2596_s26 = smov %s1485_s28  ;;  %19 = sbr.rel (!%p17_p3) target bundleno = 5 (0x5), region = 79 }
 0x2b9   :  { %1171 = vsyncpa [#allocation4], 1 }
 0x2ba   :  { %1173 = vsyncpa [#allocation4 + $0x1], 1 }

</bundles_post_ra>
